<compile_context>
chip_gen: v6e
topology: v6e:2x2x1
jax: 0.10.0
libtpu: 0.0.40
codegen_flags: <defaults>
</compile_context>

<pallas_src>
import functools

import jax
import jax.numpy as jnp
from jax.experimental import pallas as pl
from jax.experimental.pallas import tpu as pltpu

INPUT_SIZE = 10
HIDDEN_SIZE = 50
OUTPUT_SIZE = 3
NUM_LAYERS = 1  # single-layer LSTM, as in the module

LANE = 128
SUBLANE = 8


def _round_up(n, m):
    return (n + m - 1) // m * m


HP = _round_up(HIDDEN_SIZE, LANE)   # 128  (per-gate lane group)
OP = _round_up(OUTPUT_SIZE, LANE)   # 128  (lane-dense head / output)


def _sigmoid_via_tanh(v):
    # Exact identity; keeps the serial-path EUP work to tanh pushes only.
    return 0.5 * jnp.tanh(0.5 * v) + 0.5


def _lstm_linear_kernel(x_ref,      # (T*Bp, I)    bf16
                        wih_ref,    # (I, 4*Hp)    bf16  (per-gate cols zero-padded)
                        whh_ref,    # (Hp, 4*Hp)   bf16  (padded rows/cols zero)
                        b_ref,      # (1, 4*Hp)    f32   (b_ih + b_hh, padded zero)
                        wlin_ref,   # (Hp, Op)     bf16  (padded rows/cols zero)
                        blin_ref,   # (1, Op)      f32   (padded zero)
                        out_ref,    # (Bp, Op)     f32
                        xb_ref,     # (T*Bp, 4*Hp) f32   VMEM scratch
                        *, T, Bp, Hp):
    bf16 = jnp.bfloat16

    # --- hoisted input projection: one MXU call with M = T*Bp ----------------
    # Result parked in VMEM scratch so it is not carried in vregs across the
    # fully-unrolled recurrence (a static Python unroll does not bound live
    # ranges; keeping this as an SSA value forces spills).
    xb_ref[...] = (
        jnp.dot(x_ref[...], wih_ref[...], preferred_element_type=jnp.float32)
        + b_ref[...]
    )

    # h_0 = c_0 = 0 (PyTorch default when no initial state is passed); carried
    # as values (one (8,128) vreg each), not VMEM scratch.
    h = jnp.zeros((Bp, Hp), jnp.float32)
    c = jnp.zeros((Bp, Hp), jnp.float32)

    # --- recurrence, fully unrolled (T is static) -----------------------------
    # Per-step xb slice is a sublane-tile-aligned static slice of the scratch
    # ref; every gate slice is a whole 128-lane group (no cross-lane work).
    for t in range(T):
        gates = (
            jnp.dot(h.astype(bf16), whh_ref[...],
                    preferred_element_type=jnp.float32)
            + xb_ref[pl.ds(t * Bp, Bp), :]
        )                                                  # (Bp, 4*Hp) f32
        i_g = _sigmoid_via_tanh(gates[:, 0 * Hp:1 * Hp])
        f_g = _sigmoid_via_tanh(gates[:, 1 * Hp:2 * Hp])
        g_g = jnp.tanh(gates[:, 2 * Hp:3 * Hp])
        o_g = _sigmoid_via_tanh(gates[:, 3 * Hp:4 * Hp])
        c = f_g * c + i_g * g_g
        h = o_g * jnp.tanh(c)

    # --- lane-dense linear head on the last hidden state ----------------------
    out_ref[...] = (
        jnp.dot(h.astype(bf16), wlin_ref[...],
                preferred_element_type=jnp.float32)
        + blin_ref[...]
    ).astype(out_ref.dtype)


def pack_weights(w_ih, w_hh, b_ih, b_hh, w_lin, b_lin):
    """One-time repacking of PyTorch-layout LSTM/Linear weights (outside jit path)."""
    H, Hp, O, Op = HIDDEN_SIZE, HP, OUTPUT_SIZE, OP

    def pad_gate_cols(w):  # (rows, 4H) -> (rows, 4*Hp), per-gate zero padding
        r = w.shape[0]
        return jnp.pad(
            w.reshape(r, 4, H), ((0, 0), (0, 0), (0, Hp - H))
        ).reshape(r, 4 * Hp)

    wih_p = pad_gate_cols(jnp.transpose(w_ih)).astype(jnp.bfloat16)      # (I, 4Hp)
    whh_p = pad_gate_cols(jnp.transpose(w_hh))                           # (H, 4Hp)
    whh_p = jnp.pad(whh_p, ((0, Hp - H), (0, 0))).astype(jnp.bfloat16)   # (Hp, 4Hp)
    b_p = jnp.pad((b_ih + b_hh).astype(jnp.float32).reshape(4, H),
                  ((0, 0), (0, Hp - H))).reshape(1, 4 * Hp)              # (1, 4Hp)
    wlin_p = jnp.pad(jnp.transpose(w_lin),
                     ((0, Hp - H), (0, Op - O))).astype(jnp.bfloat16)    # (Hp, Op)
    blin_p = jnp.pad(b_lin.astype(jnp.float32), (0, Op - O)).reshape(1, Op)
    return wih_p, whh_p, b_p, wlin_p, blin_p


@jax.jit
def preference_predictor(x, wih_p, whh_p, b_p, wlin_p, blin_p):
    """x: (B, T, I) float32, pre-packed weights -> (B, O) float32."""
    B, T, I = x.shape
    Bp = _round_up(B, SUBLANE)    # 8: sublane-tile-aligned per-step row blocks

    # x: (B, T, I) -> (T, Bp, I) -> (T*Bp, I), batch zero-padded, bf16 operands.
    x_tbi = jnp.transpose(x, (1, 0, 2))
    x_tbi = jnp.pad(x_tbi, ((0, 0), (0, Bp - B), (0, 0)))
    x2d = x_tbi.reshape(T * Bp, I).astype(jnp.bfloat16)

    vmem = pl.BlockSpec(memory_space=pltpu.MemorySpace.VMEM)
    out_p = pl.pallas_call(
        functools.partial(_lstm_linear_kernel, T=T, Bp=Bp, Hp=HP),
        out_shape=jax.ShapeDtypeStruct((Bp, OP), jnp.float32),
        in_specs=[vmem] * 6,
        out_specs=vmem,
        scratch_shapes=[pltpu.VMEM((T * Bp, 4 * HP), jnp.float32)],
    )(x2d, wih_p, whh_p, b_p, wlin_p, blin_p)
    return out_p[:B, :OUTPUT_SIZE]


def _reference(x, w_ih, w_hh, b_ih, b_hh, w_lin, b_lin):
    """Pure-JAX reference: PyTorch LSTM semantics (gate order i,f,g,o), with the
    same explicit numerics as the kernel (bf16 matmul operands, f32 accumulate,
    f32 element-wise math)."""
    bf16 = jnp.bfloat16
    B, T, I = x.shape
    H = HIDDEN_SIZE
    wih_t = jnp.transpose(w_ih).astype(bf16)
    whh_t = jnp.transpose(w_hh).astype(bf16)
    wlin_t = jnp.transpose(w_lin).astype(bf16)
    b = (b_ih + b_hh).astype(jnp.float32)
    h = jnp.zeros((B, H), jnp.float32)
    c = jnp.zeros((B, H), jnp.float32)
    for t in range(T):
        g = (jnp.dot(x[:, t, :].astype(bf16), wih_t,
                     preferred_element_type=jnp.float32)
             + jnp.dot(h.astype(bf16), whh_t,
                       preferred_element_type=jnp.float32)
             + b)
        i_g = jax.nn.sigmoid(g[:, 0 * H:1 * H])
        f_g = jax.nn.sigmoid(g[:, 1 * H:2 * H])
        g_g = jnp.tanh(g[:, 2 * H:3 * H])
        o_g = jax.nn.sigmoid(g[:, 3 * H:4 * H])
        c = f_g * c + i_g * g_g
        h = o_g * jnp.tanh(c)
    return (jnp.dot(h.astype(bf16), wlin_t, preferred_element_type=jnp.float32)
            + b_lin)


if __name__ == "__main__":
    B, T = 2, 8
    I, H, O = INPUT_SIZE, HIDDEN_SIZE, OUTPUT_SIZE

    key = jax.random.PRNGKey(0)
    kx, k1, k2, k3, k4, k5, k6 = jax.random.split(key, 7)

    # PyTorch default init: U(-1/sqrt(H), 1/sqrt(H)) for LSTM and Linear params.
    bound = 1.0 / jnp.sqrt(jnp.float32(H))
    w_ih = jax.random.uniform(k1, (4 * H, I), jnp.float32, -bound, bound)
    w_hh = jax.random.uniform(k2, (4 * H, H), jnp.float32, -bound, bound)
    b_ih = jax.random.uniform(k3, (4 * H,), jnp.float32, -bound, bound)
    b_hh = jax.random.uniform(k4, (4 * H,), jnp.float32, -bound, bound)
    w_lin = jax.random.uniform(k5, (O, H), jnp.float32, -bound, bound)
    b_lin = jax.random.uniform(k6, (O,), jnp.float32, -bound, bound)

    x = jax.random.normal(kx, (B, T, I), jnp.float32)

    # One-time weight repacking, outside the jit'd per-call path.
    packed = pack_weights(w_ih, w_hh, b_ih, b_hh, w_lin, b_lin)
    packed = jax.block_until_ready(packed)

    out = preference_predictor(x, *packed)
    out = jax.block_until_ready(out)

    ref = _reference(x, w_ih, w_hh, b_ih, b_hh, w_lin, b_lin)
    assert out.shape == (B, O)
    # Tolerance covers MXU-vs-XLA accumulation-order differences only; both
    # sides use identical bf16-operand / f32-accumulate numerics.
    assert jnp.allclose(out, ref, atol=1e-3, rtol=1e-3), (out, ref)

    print("KERNEL_OK")
</pallas_src>

<mosaic_0001>
module attributes {stable_mosaic.version = 11 : i64} {
  func.func @_lstm_linear_kernel(%arg0: memref<64x10xbf16, #tpu.memory_space<vmem>>, %arg1: memref<10x512xbf16, #tpu.memory_space<vmem>>, %arg2: memref<128x512xbf16, #tpu.memory_space<vmem>>, %arg3: memref<1x512xf32, #tpu.memory_space<vmem>>, %arg4: memref<128x128xbf16, #tpu.memory_space<vmem>>, %arg5: memref<1x128xf32, #tpu.memory_space<vmem>>, %arg6: memref<8x128xf32, #tpu.memory_space<vmem>>, %arg7: memref<64x512xf32, #tpu.memory_space<vmem>>) attributes {dimension_semantics = [], scalar_prefetch = 0 : i64, scratch_operands = 1 : i64, tpu.core_type = #tpu.core_type<tc>} {
    %c0 = arith.constant 0 : index
    %c0_0 = arith.constant 0 : index
    %0 = vector.load %arg0[%c0, %c0_0] : memref<64x10xbf16, #tpu.memory_space<vmem>>, vector<64x10xbf16>
    %c0_1 = arith.constant 0 : index
    %c0_2 = arith.constant 0 : index
    %1 = vector.load %arg1[%c0_1, %c0_2] : memref<10x512xbf16, #tpu.memory_space<vmem>>, vector<10x512xbf16>
    %cst = arith.constant dense<0.000000e+00> : vector<64x512xf32>
    %2 = tpu.matmul %0, %1, %cst {dimension_numbers = #tpu.dot_dimension_numbers<[1], [0], [0], [1], [0, 0, 1, 1], [], []>} : vector<64x10xbf16>, vector<10x512xbf16>, vector<64x512xf32> -> vector<64x512xf32>
    %c0_3 = arith.constant 0 : index
    %c0_4 = arith.constant 0 : index
    %3 = vector.load %arg3[%c0_3, %c0_4] : memref<1x512xf32, #tpu.memory_space<vmem>>, vector<1x512xf32>
    %4 = vector.broadcast %3 : vector<1x512xf32> to vector<64x512xf32>
    %5 = arith.addf %2, %4 : vector<64x512xf32>
    %c0_5 = arith.constant 0 : index
    %c0_6 = arith.constant 0 : index
    %6 = vector.load %arg7[%c0_5, %c0_6] : memref<64x512xf32, #tpu.memory_space<vmem>>, vector<64x512xf32>
    tpu.vector_store %arg7[%c0_5, %c0_6], %5 {strides = array<i32>} : memref<64x512xf32, #tpu.memory_space<vmem>>, vector<64x512xf32>,
    %cst_7 = arith.constant 0.000000e+00 : f32
    %7 = vector.broadcast %cst_7 : f32 to vector<8x128xf32>
    %cst_8 = arith.constant 0.000000e+00 : f32
    %8 = vector.broadcast %cst_8 : f32 to vector<8x128xf32>
    %9 = arith.truncf %7 : vector<8x128xf32> to vector<8x128xbf16>
    %c0_9 = arith.constant 0 : index
    %c0_10 = arith.constant 0 : index
    %10 = vector.load %arg2[%c0_9, %c0_10] : memref<128x512xbf16, #tpu.memory_space<vmem>>, vector<128x512xbf16>
    %cst_11 = arith.constant dense<0.000000e+00> : vector<8x512xf32>
    %11 = tpu.matmul %9, %10, %cst_11 {dimension_numbers = #tpu.dot_dimension_numbers<[1], [0], [0], [1], [0, 0, 1, 1], [], []>} : vector<8x128xbf16>, vector<128x512xbf16>, vector<8x512xf32> -> vector<8x512xf32>
    %c0_12 = arith.constant 0 : index
    %c0_13 = arith.constant 0 : index
    %12 = vector.load %arg7[%c0_12, %c0_13] : memref<64x512xf32, #tpu.memory_space<vmem>>, vector<8x512xf32>
    %13 = arith.addf %11, %12 : vector<8x512xf32>
    %14 = vector.extract_strided_slice %13 {offsets = [0, 0], sizes = [8, 128], strides = [1, 1]} : vector<8x512xf32> to vector<8x128xf32>
    %cst_14 = arith.constant 5.000000e-01 : f32
    %15 = vector.broadcast %cst_14 : f32 to vector<8x128xf32>
    %16 = arith.mulf %15, %14 : vector<8x128xf32>
    %17 = math.tanh %16 : vector<8x128xf32>
    %cst_15 = arith.constant 5.000000e-01 : f32
    %18 = vector.broadcast %cst_15 : f32 to vector<8x128xf32>
    %19 = arith.mulf %18, %17 : vector<8x128xf32>
    %cst_16 = arith.constant 5.000000e-01 : f32
    %20 = vector.broadcast %cst_16 : f32 to vector<8x128xf32>
    %21 = arith.addf %19, %20 : vector<8x128xf32>
    %22 = vector.extract_strided_slice %13 {offsets = [0, 128], sizes = [8, 128], strides = [1, 1]} : vector<8x512xf32> to vector<8x128xf32>
    %cst_17 = arith.constant 5.000000e-01 : f32
    %23 = vector.broadcast %cst_17 : f32 to vector<8x128xf32>
    %24 = arith.mulf %23, %22 : vector<8x128xf32>
    %25 = math.tanh %24 : vector<8x128xf32>
    %cst_18 = arith.constant 5.000000e-01 : f32
    %26 = vector.broadcast %cst_18 : f32 to vector<8x128xf32>
    %27 = arith.mulf %26, %25 : vector<8x128xf32>
    %cst_19 = arith.constant 5.000000e-01 : f32
    %28 = vector.broadcast %cst_19 : f32 to vector<8x128xf32>
    %29 = arith.addf %27, %28 : vector<8x128xf32>
    %30 = vector.extract_strided_slice %13 {offsets = [0, 256], sizes = [8, 128], strides = [1, 1]} : vector<8x512xf32> to vector<8x128xf32>
    %31 = math.tanh %30 : vector<8x128xf32>
    %32 = vector.extract_strided_slice %13 {offsets = [0, 384], sizes = [8, 128], strides = [1, 1]} : vector<8x512xf32> to vector<8x128xf32>
    %cst_20 = arith.constant 5.000000e-01 : f32
    %33 = vector.broadcast %cst_20 : f32 to vector<8x128xf32>
    %34 = arith.mulf %33, %32 : vector<8x128xf32>
    %35 = math.tanh %34 : vector<8x128xf32>
    %cst_21 = arith.constant 5.000000e-01 : f32
    %36 = vector.broadcast %cst_21 : f32 to vector<8x128xf32>
    %37 = arith.mulf %36, %35 : vector<8x128xf32>
    %cst_22 = arith.constant 5.000000e-01 : f32
    %38 = vector.broadcast %cst_22 : f32 to vector<8x128xf32>
    %39 = arith.addf %37, %38 : vector<8x128xf32>
    %40 = arith.mulf %29, %8 : vector<8x128xf32>
    %41 = arith.mulf %21, %31 : vector<8x128xf32>
    %42 = arith.addf %40, %41 : vector<8x128xf32>
    %43 = math.tanh %42 : vector<8x128xf32>
    %44 = arith.mulf %39, %43 : vector<8x128xf32>
    %45 = arith.truncf %44 : vector<8x128xf32> to vector<8x128xbf16>
    %c0_23 = arith.constant 0 : index
    %c0_24 = arith.constant 0 : index
    %46 = vector.load %arg2[%c0_23, %c0_24] : memref<128x512xbf16, #tpu.memory_space<vmem>>, vector<128x512xbf16>
    %cst_25 = arith.constant dense<0.000000e+00> : vector<8x512xf32>
    %47 = tpu.matmul %45, %46, %cst_25 {dimension_numbers = #tpu.dot_dimension_numbers<[1], [0], [0], [1], [0, 0, 1, 1], [], []>} : vector<8x128xbf16>, vector<128x512xbf16>, vector<8x512xf32> -> vector<8x512xf32>
    %c8 = arith.constant 8 : index
    %c0_26 = arith.constant 0 : index
    %48 = vector.load %arg7[%c8, %c0_26] : memref<64x512xf32, #tpu.memory_space<vmem>>, vector<8x512xf32>
    %49 = arith.addf %47, %48 : vector<8x512xf32>
    %50 = vector.extract_strided_slice %49 {offsets = [0, 0], sizes = [8, 128], strides = [1, 1]} : vector<8x512xf32> to vector<8x128xf32>
    %cst_27 = arith.constant 5.000000e-01 : f32
    %51 = vector.broadcast %cst_27 : f32 to vector<8x128xf32>
    %52 = arith.mulf %51, %50 : vector<8x128xf32>
    %53 = math.tanh %52 : vector<8x128xf32>
    %cst_28 = arith.constant 5.000000e-01 : f32
    %54 = vector.broadcast %cst_28 : f32 to vector<8x128xf32>
    %55 = arith.mulf %54, %53 : vector<8x128xf32>
    %cst_29 = arith.constant 5.000000e-01 : f32
    %56 = vector.broadcast %cst_29 : f32 to vector<8x128xf32>
    %57 = arith.addf %55, %56 : vector<8x128xf32>
    %58 = vector.extract_strided_slice %49 {offsets = [0, 128], sizes = [8, 128], strides = [1, 1]} : vector<8x512xf32> to vector<8x128xf32>
    %cst_30 = arith.constant 5.000000e-01 : f32
    %59 = vector.broadcast %cst_30 : f32 to vector<8x128xf32>
    %60 = arith.mulf %59, %58 : vector<8x128xf32>
    %61 = math.tanh %60 : vector<8x128xf32>
    %cst_31 = arith.constant 5.000000e-01 : f32
    %62 = vector.broadcast %cst_31 : f32 to vector<8x128xf32>
    %63 = arith.mulf %62, %61 : vector<8x128xf32>
    %cst_32 = arith.constant 5.000000e-01 : f32
    %64 = vector.broadcast %cst_32 : f32 to vector<8x128xf32>
    %65 = arith.addf %63, %64 : vector<8x128xf32>
    %66 = vector.extract_strided_slice %49 {offsets = [0, 256], sizes = [8, 128], strides = [1, 1]} : vector<8x512xf32> to vector<8x128xf32>
    %67 = math.tanh %66 : vector<8x128xf32>
    %68 = vector.extract_strided_slice %49 {offsets = [0, 384], sizes = [8, 128], strides = [1, 1]} : vector<8x512xf32> to vector<8x128xf32>
    %cst_33 = arith.constant 5.000000e-01 : f32
    %69 = vector.broadcast %cst_33 : f32 to vector<8x128xf32>
    %70 = arith.mulf %69, %68 : vector<8x128xf32>
    %71 = math.tanh %70 : vector<8x128xf32>
    %cst_34 = arith.constant 5.000000e-01 : f32
    %72 = vector.broadcast %cst_34 : f32 to vector<8x128xf32>
    %73 = arith.mulf %72, %71 : vector<8x128xf32>
    %cst_35 = arith.constant 5.000000e-01 : f32
    %74 = vector.broadcast %cst_35 : f32 to vector<8x128xf32>
    %75 = arith.addf %73, %74 : vector<8x128xf32>
    %76 = arith.mulf %65, %42 : vector<8x128xf32>
    %77 = arith.mulf %57, %67 : vector<8x128xf32>
    %78 = arith.addf %76, %77 : vector<8x128xf32>
    %79 = math.tanh %78 : vector<8x128xf32>
    %80 = arith.mulf %75, %79 : vector<8x128xf32>
    %81 = arith.truncf %80 : vector<8x128xf32> to vector<8x128xbf16>
    %c0_36 = arith.constant 0 : index
    %c0_37 = arith.constant 0 : index
    %82 = vector.load %arg2[%c0_36, %c0_37] : memref<128x512xbf16, #tpu.memory_space<vmem>>, vector<128x512xbf16>
    %cst_38 = arith.constant dense<0.000000e+00> : vector<8x512xf32>
    %83 = tpu.matmul %81, %82, %cst_38 {dimension_numbers = #tpu.dot_dimension_numbers<[1], [0], [0], [1], [0, 0, 1, 1], [], []>} : vector<8x128xbf16>, vector<128x512xbf16>, vector<8x512xf32> -> vector<8x512xf32>
    %c16 = arith.constant 16 : index
    %c0_39 = arith.constant 0 : index
    %84 = vector.load %arg7[%c16, %c0_39] : memref<64x512xf32, #tpu.memory_space<vmem>>, vector<8x512xf32>
    %85 = arith.addf %83, %84 : vector<8x512xf32>
    %86 = vector.extract_strided_slice %85 {offsets = [0, 0], sizes = [8, 128], strides = [1, 1]} : vector<8x512xf32> to vector<8x128xf32>
    %cst_40 = arith.constant 5.000000e-01 : f32
    %87 = vector.broadcast %cst_40 : f32 to vector<8x128xf32>
    %88 = arith.mulf %87, %86 : vector<8x128xf32>
    %89 = math.tanh %88 : vector<8x128xf32>
    %cst_41 = arith.constant 5.000000e-01 : f32
    %90 = vector.broadcast %cst_41 : f32 to vector<8x128xf32>
    %91 = arith.mulf %90, %89 : vector<8x128xf32>
    %cst_42 = arith.constant 5.000000e-01 : f32
    %92 = vector.broadcast %cst_42 : f32 to vector<8x128xf32>
    %93 = arith.addf %91, %92 : vector<8x128xf32>
    %94 = vector.extract_strided_slice %85 {offsets = [0, 128], sizes = [8, 128], strides = [1, 1]} : vector<8x512xf32> to vector<8x128xf32>
    %cst_43 = arith.constant 5.000000e-01 : f32
    %95 = vector.broadcast %cst_43 : f32 to vector<8x128xf32>
    %96 = arith.mulf %95, %94 : vector<8x128xf32>
    %97 = math.tanh %96 : vector<8x128xf32>
    %cst_44 = arith.constant 5.000000e-01 : f32
    %98 = vector.broadcast %cst_44 : f32 to vector<8x128xf32>
    %99 = arith.mulf %98, %97 : vector<8x128xf32>
    %cst_45 = arith.constant 5.000000e-01 : f32
    %100 = vector.broadcast %cst_45 : f32 to vector<8x128xf32>
    %101 = arith.addf %99, %100 : vector<8x128xf32>
    %102 = vector.extract_strided_slice %85 {offsets = [0, 256], sizes = [8, 128], strides = [1, 1]} : vector<8x512xf32> to vector<8x128xf32>
    %103 = math.tanh %102 : vector<8x128xf32>
    %104 = vector.extract_strided_slice %85 {offsets = [0, 384], sizes = [8, 128], strides = [1, 1]} : vector<8x512xf32> to vector<8x128xf32>
    %cst_46 = arith.constant 5.000000e-01 : f32
    %105 = vector.broadcast %cst_46 : f32 to vector<8x128xf32>
    %106 = arith.mulf %105, %104 : vector<8x128xf32>
    %107 = math.tanh %106 : vector<8x128xf32>
    %cst_47 = arith.constant 5.000000e-01 : f32
    %108 = vector.broadcast %cst_47 : f32 to vector<8x128xf32>
    %109 = arith.mulf %108, %107 : vector<8x128xf32>
    %cst_48 = arith.constant 5.000000e-01 : f32
    %110 = vector.broadcast %cst_48 : f32 to vector<8x128xf32>
    %111 = arith.addf %109, %110 : vector<8x128xf32>
    %112 = arith.mulf %101, %78 : vector<8x128xf32>
    %113 = arith.mulf %93, %103 : vector<8x128xf32>
    %114 = arith.addf %112, %113 : vector<8x128xf32>
    %115 = math.tanh %114 : vector<8x128xf32>
    %116 = arith.mulf %111, %115 : vector<8x128xf32>
    %117 = arith.truncf %116 : vector<8x128xf32> to vector<8x128xbf16>
    %c0_49 = arith.constant 0 : index
    %c0_50 = arith.constant 0 : index
    %118 = vector.load %arg2[%c0_49, %c0_50] : memref<128x512xbf16, #tpu.memory_space<vmem>>, vector<128x512xbf16>
    %cst_51 = arith.constant dense<0.000000e+00> : vector<8x512xf32>
    %119 = tpu.matmul %117, %118, %cst_51 {dimension_numbers = #tpu.dot_dimension_numbers<[1], [0], [0], [1], [0, 0, 1, 1], [], []>} : vector<8x128xbf16>, vector<128x512xbf16>, vector<8x512xf32> -> vector<8x512xf32>
    %c24 = arith.constant 24 : index
    %c0_52 = arith.constant 0 : index
    %120 = vector.load %arg7[%c24, %c0_52] : memref<64x512xf32, #tpu.memory_space<vmem>>, vector<8x512xf32>
    %121 = arith.addf %119, %120 : vector<8x512xf32>
    %122 = vector.extract_strided_slice %121 {offsets = [0, 0], sizes = [8, 128], strides = [1, 1]} : vector<8x512xf32> to vector<8x128xf32>
    %cst_53 = arith.constant 5.000000e-01 : f32
    %123 = vector.broadcast %cst_53 : f32 to vector<8x128xf32>
    %124 = arith.mulf %123, %122 : vector<8x128xf32>
    %125 = math.tanh %124 : vector<8x128xf32>
    %cst_54 = arith.constant 5.000000e-01 : f32
    %126 = vector.broadcast %cst_54 : f32 to vector<8x128xf32>
    %127 = arith.mulf %126, %125 : vector<8x128xf32>
    %cst_55 = arith.constant 5.000000e-01 : f32
    %128 = vector.broadcast %cst_55 : f32 to vector<8x128xf32>
    %129 = arith.addf %127, %128 : vector<8x128xf32>
    %130 = vector.extract_strided_slice %121 {offsets = [0, 128], sizes = [8, 128], strides = [1, 1]} : vector<8x512xf32> to vector<8x128xf32>
    %cst_56 = arith.constant 5.000000e-01 : f32
    %131 = vector.broadcast %cst_56 : f32 to vector<8x128xf32>
    %132 = arith.mulf %131, %130 : vector<8x128xf32>
    %133 = math.tanh %132 : vector<8x128xf32>
    %cst_57 = arith.constant 5.000000e-01 : f32
    %134 = vector.broadcast %cst_57 : f32 to vector<8x128xf32>
    %135 = arith.mulf %134, %133 : vector<8x128xf32>
    %cst_58 = arith.constant 5.000000e-01 : f32
    %136 = vector.broadcast %cst_58 : f32 to vector<8x128xf32>
    %137 = arith.addf %135, %136 : vector<8x128xf32>
    %138 = vector.extract_strided_slice %121 {offsets = [0, 256], sizes = [8, 128], strides = [1, 1]} : vector<8x512xf32> to vector<8x128xf32>
    %139 = math.tanh %138 : vector<8x128xf32>
    %140 = vector.extract_strided_slice %121 {offsets = [0, 384], sizes = [8, 128], strides = [1, 1]} : vector<8x512xf32> to vector<8x128xf32>
    %cst_59 = arith.constant 5.000000e-01 : f32
    %141 = vector.broadcast %cst_59 : f32 to vector<8x128xf32>
    %142 = arith.mulf %141, %140 : vector<8x128xf32>
    %143 = math.tanh %142 : vector<8x128xf32>
    %cst_60 = arith.constant 5.000000e-01 : f32
    %144 = vector.broadcast %cst_60 : f32 to vector<8x128xf32>
    %145 = arith.mulf %144, %143 : vector<8x128xf32>
    %cst_61 = arith.constant 5.000000e-01 : f32
    %146 = vector.broadcast %cst_61 : f32 to vector<8x128xf32>
    %147 = arith.addf %145, %146 : vector<8x128xf32>
    %148 = arith.mulf %137, %114 : vector<8x128xf32>
    %149 = arith.mulf %129, %139 : vector<8x128xf32>
    %150 = arith.addf %148, %149 : vector<8x128xf32>
    %151 = math.tanh %150 : vector<8x128xf32>
    %152 = arith.mulf %147, %151 : vector<8x128xf32>
    %153 = arith.truncf %152 : vector<8x128xf32> to vector<8x128xbf16>
    %c0_62 = arith.constant 0 : index
    %c0_63 = arith.constant 0 : index
    %154 = vector.load %arg2[%c0_62, %c0_63] : memref<128x512xbf16, #tpu.memory_space<vmem>>, vector<128x512xbf16>
    %cst_64 = arith.constant dense<0.000000e+00> : vector<8x512xf32>
    %155 = tpu.matmul %153, %154, %cst_64 {dimension_numbers = #tpu.dot_dimension_numbers<[1], [0], [0], [1], [0, 0, 1, 1], [], []>} : vector<8x128xbf16>, vector<128x512xbf16>, vector<8x512xf32> -> vector<8x512xf32>
    %c32 = arith.constant 32 : index
    %c0_65 = arith.constant 0 : index
    %156 = vector.load %arg7[%c32, %c0_65] : memref<64x512xf32, #tpu.memory_space<vmem>>, vector<8x512xf32>
    %157 = arith.addf %155, %156 : vector<8x512xf32>
    %158 = vector.extract_strided_slice %157 {offsets = [0, 0], sizes = [8, 128], strides = [1, 1]} : vector<8x512xf32> to vector<8x128xf32>
    %cst_66 = arith.constant 5.000000e-01 : f32
    %159 = vector.broadcast %cst_66 : f32 to vector<8x128xf32>
    %160 = arith.mulf %159, %158 : vector<8x128xf32>
    %161 = math.tanh %160 : vector<8x128xf32>
    %cst_67 = arith.constant 5.000000e-01 : f32
    %162 = vector.broadcast %cst_67 : f32 to vector<8x128xf32>
    %163 = arith.mulf %162, %161 : vector<8x128xf32>
    %cst_68 = arith.constant 5.000000e-01 : f32
    %164 = vector.broadcast %cst_68 : f32 to vector<8x128xf32>
    %165 = arith.addf %163, %164 : vector<8x128xf32>
    %166 = vector.extract_strided_slice %157 {offsets = [0, 128], sizes = [8, 128], strides = [1, 1]} : vector<8x512xf32> to vector<8x128xf32>
    %cst_69 = arith.constant 5.000000e-01 : f32
    %167 = vector.broadcast %cst_69 : f32 to vector<8x128xf32>
    %168 = arith.mulf %167, %166 : vector<8x128xf32>
    %169 = math.tanh %168 : vector<8x128xf32>
    %cst_70 = arith.constant 5.000000e-01 : f32
    %170 = vector.broadcast %cst_70 : f32 to vector<8x128xf32>
    %171 = arith.mulf %170, %169 : vector<8x128xf32>
    %cst_71 = arith.constant 5.000000e-01 : f32
    %172 = vector.broadcast %cst_71 : f32 to vector<8x128xf32>
    %173 = arith.addf %171, %172 : vector<8x128xf32>
    %174 = vector.extract_strided_slice %157 {offsets = [0, 256], sizes = [8, 128], strides = [1, 1]} : vector<8x512xf32> to vector<8x128xf32>
    %175 = math.tanh %174 : vector<8x128xf32>
    %176 = vector.extract_strided_slice %157 {offsets = [0, 384], sizes = [8, 128], strides = [1, 1]} : vector<8x512xf32> to vector<8x128xf32>
    %cst_72 = arith.constant 5.000000e-01 : f32
    %177 = vector.broadcast %cst_72 : f32 to vector<8x128xf32>
    %178 = arith.mulf %177, %176 : vector<8x128xf32>
    %179 = math.tanh %178 : vector<8x128xf32>
    %cst_73 = arith.constant 5.000000e-01 : f32
    %180 = vector.broadcast %cst_73 : f32 to vector<8x128xf32>
    %181 = arith.mulf %180, %179 : vector<8x128xf32>
    %cst_74 = arith.constant 5.000000e-01 : f32
    %182 = vector.broadcast %cst_74 : f32 to vector<8x128xf32>
    %183 = arith.addf %181, %182 : vector<8x128xf32>
    %184 = arith.mulf %173, %150 : vector<8x128xf32>
    %185 = arith.mulf %165, %175 : vector<8x128xf32>
    %186 = arith.addf %184, %185 : vector<8x128xf32>
    %187 = math.tanh %186 : vector<8x128xf32>
    %188 = arith.mulf %183, %187 : vector<8x128xf32>
    %189 = arith.truncf %188 : vector<8x128xf32> to vector<8x128xbf16>
    %c0_75 = arith.constant 0 : index
    %c0_76 = arith.constant 0 : index
    %190 = vector.load %arg2[%c0_75, %c0_76] : memref<128x512xbf16, #tpu.memory_space<vmem>>, vector<128x512xbf16>
    %cst_77 = arith.constant dense<0.000000e+00> : vector<8x512xf32>
    %191 = tpu.matmul %189, %190, %cst_77 {dimension_numbers = #tpu.dot_dimension_numbers<[1], [0], [0], [1], [0, 0, 1, 1], [], []>} : vector<8x128xbf16>, vector<128x512xbf16>, vector<8x512xf32> -> vector<8x512xf32>
    %c40 = arith.constant 40 : index
    %c0_78 = arith.constant 0 : index
    %192 = vector.load %arg7[%c40, %c0_78] : memref<64x512xf32, #tpu.memory_space<vmem>>, vector<8x512xf32>
    %193 = arith.addf %191, %192 : vector<8x512xf32>
    %194 = vector.extract_strided_slice %193 {offsets = [0, 0], sizes = [8, 128], strides = [1, 1]} : vector<8x512xf32> to vector<8x128xf32>
    %cst_79 = arith.constant 5.000000e-01 : f32
    %195 = vector.broadcast %cst_79 : f32 to vector<8x128xf32>
    %196 = arith.mulf %195, %194 : vector<8x128xf32>
    %197 = math.tanh %196 : vector<8x128xf32>
    %cst_80 = arith.constant 5.000000e-01 : f32
    %198 = vector.broadcast %cst_80 : f32 to vector<8x128xf32>
    %199 = arith.mulf %198, %197 : vector<8x128xf32>
    %cst_81 = arith.constant 5.000000e-01 : f32
    %200 = vector.broadcast %cst_81 : f32 to vector<8x128xf32>
    %201 = arith.addf %199, %200 : vector<8x128xf32>
    %202 = vector.extract_strided_slice %193 {offsets = [0, 128], sizes = [8, 128], strides = [1, 1]} : vector<8x512xf32> to vector<8x128xf32>
    %cst_82 = arith.constant 5.000000e-01 : f32
    %203 = vector.broadcast %cst_82 : f32 to vector<8x128xf32>
    %204 = arith.mulf %203, %202 : vector<8x128xf32>
    %205 = math.tanh %204 : vector<8x128xf32>
    %cst_83 = arith.constant 5.000000e-01 : f32
    %206 = vector.broadcast %cst_83 : f32 to vector<8x128xf32>
    %207 = arith.mulf %206, %205 : vector<8x128xf32>
    %cst_84 = arith.constant 5.000000e-01 : f32
    %208 = vector.broadcast %cst_84 : f32 to vector<8x128xf32>
    %209 = arith.addf %207, %208 : vector<8x128xf32>
    %210 = vector.extract_strided_slice %193 {offsets = [0, 256], sizes = [8, 128], strides = [1, 1]} : vector<8x512xf32> to vector<8x128xf32>
    %211 = math.tanh %210 : vector<8x128xf32>
    %212 = vector.extract_strided_slice %193 {offsets = [0, 384], sizes = [8, 128], strides = [1, 1]} : vector<8x512xf32> to vector<8x128xf32>
    %cst_85 = arith.constant 5.000000e-01 : f32
    %213 = vector.broadcast %cst_85 : f32 to vector<8x128xf32>
    %214 = arith.mulf %213, %212 : vector<8x128xf32>
    %215 = math.tanh %214 : vector<8x128xf32>
    %cst_86 = arith.constant 5.000000e-01 : f32
    %216 = vector.broadcast %cst_86 : f32 to vector<8x128xf32>
    %217 = arith.mulf %216, %215 : vector<8x128xf32>
    %cst_87 = arith.constant 5.000000e-01 : f32
    %218 = vector.broadcast %cst_87 : f32 to vector<8x128xf32>
    %219 = arith.addf %217, %218 : vector<8x128xf32>
    %220 = arith.mulf %209, %186 : vector<8x128xf32>
    %221 = arith.mulf %201, %211 : vector<8x128xf32>
    %222 = arith.addf %220, %221 : vector<8x128xf32>
    %223 = math.tanh %222 : vector<8x128xf32>
    %224 = arith.mulf %219, %223 : vector<8x128xf32>
    %225 = arith.truncf %224 : vector<8x128xf32> to vector<8x128xbf16>
    %c0_88 = arith.constant 0 : index
    %c0_89 = arith.constant 0 : index
    %226 = vector.load %arg2[%c0_88, %c0_89] : memref<128x512xbf16, #tpu.memory_space<vmem>>, vector<128x512xbf16>
    %cst_90 = arith.constant dense<0.000000e+00> : vector<8x512xf32>
    %227 = tpu.matmul %225, %226, %cst_90 {dimension_numbers = #tpu.dot_dimension_numbers<[1], [0], [0], [1], [0, 0, 1, 1], [], []>} : vector<8x128xbf16>, vector<128x512xbf16>, vector<8x512xf32> -> vector<8x512xf32>
    %c48 = arith.constant 48 : index
    %c0_91 = arith.constant 0 : index
    %228 = vector.load %arg7[%c48, %c0_91] : memref<64x512xf32, #tpu.memory_space<vmem>>, vector<8x512xf32>
    %229 = arith.addf %227, %228 : vector<8x512xf32>
    %230 = vector.extract_strided_slice %229 {offsets = [0, 0], sizes = [8, 128], strides = [1, 1]} : vector<8x512xf32> to vector<8x128xf32>
    %cst_92 = arith.constant 5.000000e-01 : f32
    %231 = vector.broadcast %cst_92 : f32 to vector<8x128xf32>
    %232 = arith.mulf %231, %230 : vector<8x128xf32>
    %233 = math.tanh %232 : vector<8x128xf32>
    %cst_93 = arith.constant 5.000000e-01 : f32
    %234 = vector.broadcast %cst_93 : f32 to vector<8x128xf32>
    %235 = arith.mulf %234, %233 : vector<8x128xf32>
    %cst_94 = arith.constant 5.000000e-01 : f32
    %236 = vector.broadcast %cst_94 : f32 to vector<8x128xf32>
    %237 = arith.addf %235, %236 : vector<8x128xf32>
    %238 = vector.extract_strided_slice %229 {offsets = [0, 128], sizes = [8, 128], strides = [1, 1]} : vector<8x512xf32> to vector<8x128xf32>
    %cst_95 = arith.constant 5.000000e-01 : f32
    %239 = vector.broadcast %cst_95 : f32 to vector<8x128xf32>
    %240 = arith.mulf %239, %238 : vector<8x128xf32>
    %241 = math.tanh %240 : vector<8x128xf32>
    %cst_96 = arith.constant 5.000000e-01 : f32
    %242 = vector.broadcast %cst_96 : f32 to vector<8x128xf32>
    %243 = arith.mulf %242, %241 : vector<8x128xf32>
    %cst_97 = arith.constant 5.000000e-01 : f32
    %244 = vector.broadcast %cst_97 : f32 to vector<8x128xf32>
    %245 = arith.addf %243, %244 : vector<8x128xf32>
    %246 = vector.extract_strided_slice %229 {offsets = [0, 256], sizes = [8, 128], strides = [1, 1]} : vector<8x512xf32> to vector<8x128xf32>
    %247 = math.tanh %246 : vector<8x128xf32>
    %248 = vector.extract_strided_slice %229 {offsets = [0, 384], sizes = [8, 128], strides = [1, 1]} : vector<8x512xf32> to vector<8x128xf32>
    %cst_98 = arith.constant 5.000000e-01 : f32
    %249 = vector.broadcast %cst_98 : f32 to vector<8x128xf32>
    %250 = arith.mulf %249, %248 : vector<8x128xf32>
    %251 = math.tanh %250 : vector<8x128xf32>
    %cst_99 = arith.constant 5.000000e-01 : f32
    %252 = vector.broadcast %cst_99 : f32 to vector<8x128xf32>
    %253 = arith.mulf %252, %251 : vector<8x128xf32>
    %cst_100 = arith.constant 5.000000e-01 : f32
    %254 = vector.broadcast %cst_100 : f32 to vector<8x128xf32>
    %255 = arith.addf %253, %254 : vector<8x128xf32>
    %256 = arith.mulf %245, %222 : vector<8x128xf32>
    %257 = arith.mulf %237, %247 : vector<8x128xf32>
    %258 = arith.addf %256, %257 : vector<8x128xf32>
    %259 = math.tanh %258 : vector<8x128xf32>
    %260 = arith.mulf %255, %259 : vector<8x128xf32>
    %261 = arith.truncf %260 : vector<8x128xf32> to vector<8x128xbf16>
    %c0_101 = arith.constant 0 : index
    %c0_102 = arith.constant 0 : index
    %262 = vector.load %arg2[%c0_101, %c0_102] : memref<128x512xbf16, #tpu.memory_space<vmem>>, vector<128x512xbf16>
    %cst_103 = arith.constant dense<0.000000e+00> : vector<8x512xf32>
    %263 = tpu.matmul %261, %262, %cst_103 {dimension_numbers = #tpu.dot_dimension_numbers<[1], [0], [0], [1], [0, 0, 1, 1], [], []>} : vector<8x128xbf16>, vector<128x512xbf16>, vector<8x512xf32> -> vector<8x512xf32>
    %c56 = arith.constant 56 : index
    %c0_104 = arith.constant 0 : index
    %264 = vector.load %arg7[%c56, %c0_104] : memref<64x512xf32, #tpu.memory_space<vmem>>, vector<8x512xf32>
    %265 = arith.addf %263, %264 : vector<8x512xf32>
    %266 = vector.extract_strided_slice %265 {offsets = [0, 0], sizes = [8, 128], strides = [1, 1]} : vector<8x512xf32> to vector<8x128xf32>
    %cst_105 = arith.constant 5.000000e-01 : f32
    %267 = vector.broadcast %cst_105 : f32 to vector<8x128xf32>
    %268 = arith.mulf %267, %266 : vector<8x128xf32>
    %269 = math.tanh %268 : vector<8x128xf32>
    %cst_106 = arith.constant 5.000000e-01 : f32
    %270 = vector.broadcast %cst_106 : f32 to vector<8x128xf32>
    %271 = arith.mulf %270, %269 : vector<8x128xf32>
    %cst_107 = arith.constant 5.000000e-01 : f32
    %272 = vector.broadcast %cst_107 : f32 to vector<8x128xf32>
    %273 = arith.addf %271, %272 : vector<8x128xf32>
    %274 = vector.extract_strided_slice %265 {offsets = [0, 128], sizes = [8, 128], strides = [1, 1]} : vector<8x512xf32> to vector<8x128xf32>
    %cst_108 = arith.constant 5.000000e-01 : f32
    %275 = vector.broadcast %cst_108 : f32 to vector<8x128xf32>
    %276 = arith.mulf %275, %274 : vector<8x128xf32>
    %277 = math.tanh %276 : vector<8x128xf32>
    %cst_109 = arith.constant 5.000000e-01 : f32
    %278 = vector.broadcast %cst_109 : f32 to vector<8x128xf32>
    %279 = arith.mulf %278, %277 : vector<8x128xf32>
    %cst_110 = arith.constant 5.000000e-01 : f32
    %280 = vector.broadcast %cst_110 : f32 to vector<8x128xf32>
    %281 = arith.addf %279, %280 : vector<8x128xf32>
    %282 = vector.extract_strided_slice %265 {offsets = [0, 256], sizes = [8, 128], strides = [1, 1]} : vector<8x512xf32> to vector<8x128xf32>
    %283 = math.tanh %282 : vector<8x128xf32>
    %284 = vector.extract_strided_slice %265 {offsets = [0, 384], sizes = [8, 128], strides = [1, 1]} : vector<8x512xf32> to vector<8x128xf32>
    %cst_111 = arith.constant 5.000000e-01 : f32
    %285 = vector.broadcast %cst_111 : f32 to vector<8x128xf32>
    %286 = arith.mulf %285, %284 : vector<8x128xf32>
    %287 = math.tanh %286 : vector<8x128xf32>
    %cst_112 = arith.constant 5.000000e-01 : f32
    %288 = vector.broadcast %cst_112 : f32 to vector<8x128xf32>
    %289 = arith.mulf %288, %287 : vector<8x128xf32>
    %cst_113 = arith.constant 5.000000e-01 : f32
    %290 = vector.broadcast %cst_113 : f32 to vector<8x128xf32>
    %291 = arith.addf %289, %290 : vector<8x128xf32>
    %292 = arith.mulf %281, %258 : vector<8x128xf32>
    %293 = arith.mulf %273, %283 : vector<8x128xf32>
    %294 = arith.addf %292, %293 : vector<8x128xf32>
    %295 = math.tanh %294 : vector<8x128xf32>
    %296 = arith.mulf %291, %295 : vector<8x128xf32>
    %297 = arith.truncf %296 : vector<8x128xf32> to vector<8x128xbf16>
    %c0_114 = arith.constant 0 : index
    %c0_115 = arith.constant 0 : index
    %298 = vector.load %arg4[%c0_114, %c0_115] : memref<128x128xbf16, #tpu.memory_space<vmem>>, vector<128x128xbf16>
    %cst_116 = arith.constant dense<0.000000e+00> : vector<8x128xf32>
    %299 = tpu.matmul %297, %298, %cst_116 {dimension_numbers = #tpu.dot_dimension_numbers<[1], [0], [0], [1], [0, 0, 1, 1], [], []>} : vector<8x128xbf16>, vector<128x128xbf16>, vector<8x128xf32> -> vector<8x128xf32>
    %c0_117 = arith.constant 0 : index
    %c0_118 = arith.constant 0 : index
    %300 = vector.load %arg5[%c0_117, %c0_118] : memref<1x128xf32, #tpu.memory_space<vmem>>, vector<1x128xf32>
    %301 = vector.broadcast %300 : vector<1x128xf32> to vector<8x128xf32>
    %302 = arith.addf %299, %301 : vector<8x128xf32>
    %c0_119 = arith.constant 0 : index
    %c0_120 = arith.constant 0 : index
    %303 = vector.load %arg6[%c0_119, %c0_120] : memref<8x128xf32, #tpu.memory_space<vmem>>, vector<8x128xf32>
    tpu.vector_store %arg6[%c0_119, %c0_120], %302 {strides = array<i32>} : memref<8x128xf32, #tpu.memory_space<vmem>>, vector<8x128xf32>,
    return
  }
}

</mosaic_0001>

<bundles_post_ra>
// kernel: preference_predictor.1
= control target key start
LH: loop header
LB: loop body
LE: loop exit
PB: predicated region body
PF: predicated region fallthrough
CT: control target
= control target key end

     0   :  { %11 = vsyncpa [#allocation4], 0  ;;  %s2421_s0 = inlined_call_operand.vmem [shape: bf16[64,10], index: 0, kind: input, shape index: {}]   ;;  %s2422_s1 = inlined_call_operand.hbm [shape: bf16[10,512], index: 1, kind: input, shape index: {}]   ;;  %s2423_s2 = inlined_call_operand.hbm [shape: bf16[128,512], index: 2, kind: input, shape index: {}]   ;;  %s2424_s3 = inlined_call_operand.vmem [shape: f32[1,512], index: 3, kind: input, shape index: {}]   ;;  %s2425_s4 = inlined_call_operand.vmem [shape: bf16[128,128], index: 4, kind: input, shape index: {}]   ;;  %s2426_s5 = inlined_call_operand.vmem [shape: f32[1,128], index: 5, kind: input, shape index: {}]   ;;  %s2427_s6 = inlined_call_operand.vmem [shape: f32[8,128], index: 6, kind: output, shape index: {}]  }
   0x1   :  { %12 = vsyncpa [#allocation6], 0  ;;  %s1793_s21 = smov [#allocation3]  }
   0x2   :  { %s20_s22 = sshll.u32 %s1793_s21, 4  ;;  %s21_s22 = int_to_ptr.vmem [resolvable:$true] %s20_s22 }
   0x3   :  { %s1757_s23 = scalar_lea.vmem %s21_s22, 512  ;;  %p1762_p1 = scmp.lt.s32.totalorder %s21_s22, %s21_s22 }
   0x4   :  { %p1758_p0 = scmp.ne.s32.totalorder %s21_s22, %s1757_s23  ;;  %p1763_p2 = scmp.lt.s32.totalorder %s1757_s23, %s1757_s23 }
   0x6   :  { %p1764_p3 = por %p1763_p2, %p1762_p1 }
   0x8   :  { %p1765_p4 = pnand %p1764_p3, %p1758_p0 }
   0xa   :  { %1768 = shalt.err (!%p1765_p4)
}
   0xb   :  { %s1794_s24 = smov 256   ;;  %s1795_s25 = smov 16  }
   0xc   :  { %26 = dma.hbm_to_vmem [thread:$0]  %s2422_s1, 512, %s21_s22, [#allocation4], %s1794_s24, %s1794_s24, %s1795_s25  }
   0xd   :  { %s1796_s28 = smov [#allocation5]  }
   0xe   :  { %s32_s29 = sshll.u32 %s1796_s28, 4  ;;  %s33_s29 = int_to_ptr.vmem [resolvable:$true] %s32_s29 }
   0xf   :  { %s1777_s30 = scalar_lea.vmem %s33_s29, 4096  ;;  %p1782_p6 = scmp.lt.s32.totalorder %s33_s29, %s33_s29 }
  0x10   :  { %p1778_p5 = scmp.ne.s32.totalorder %s33_s29, %s1777_s30  ;;  %p1783_p7 = scmp.lt.s32.totalorder %s1777_s30, %s1777_s30 }
  0x12   :  { %p1784_p8 = por %p1783_p7, %p1782_p6 }
  0x14   :  { %p1785_p9 = pnand %p1784_p8, %p1778_p5 }
  0x16   :  { %1788 = shalt.err (!%p1785_p9)
}
  0x17   :  { %38 = dma.hbm_to_vmem [thread:$0]  %s2423_s2, 4096, %s33_s29, [#allocation6], %s1794_s24, %s1794_s24, %s1795_s25  }
  0x18   :  { %1789 = dma.done.wait [#allocation4], 512  }
  0x19   :  { %1790 = vsyncadd [#allocation4], 4294966784 }
  0x1a   :  { %1791 = dma.done.wait [#allocation6], 4096  }
  0x1b   :  { %1792 = vsyncadd [#allocation6], 4294963200  ;;  %v2428_v0 = vmov 0   ;;  %vm135_vm0 = vcmask 1044480   ;;  %v1577_v5 = vld [vmem:[%s2421_s0] sm:$0xff]   ;;  %vm122_vm1 = vcmask 80896   ;;  %v66_v43 = vlaneseq }
  0x1c   :  { %180 = vmatprep.mubr.bf16.mxu0 %v2428_v0  ;;  %253 = vmatprep.mubr.bf16.mxu1 %v2428_v0  ;;  %v1571_v1 = vld [vmem:[#allocation3 + $0x4] ss:$16 sps:$4 sm:$0x1f]   ;;  %v1573_v2 = vld [vmem:[#allocation3 + $0xc] ss:$16 sps:$4 sm:$0x1f]  }
  0x1d   :  { %1484 = vmatprep.subr.msk.bf16.mxu0 %vm135_vm0, %v1571_v1  ;;  %v1575_v3 = vld [vmem:[#allocation3] ss:$16 sps:$4 sm:$0x1f]   ;;  %v1576_v4 = vld [vmem:[#allocation3 + $0x8] ss:$16 sps:$4 sm:$0x1f]   ;;  %1489 = vmatprep.subr.msk.bf16.mxu1 %vm135_vm0, %v1573_v2 }
  0x1e   :  { %v137_v6 = vsel %vm135_vm0, %v1575_v3, 0  ;;  %v143_v7 = vsel %vm135_vm0, %v1576_v4, 0  ;;  %v1846_v8 = vld [vmem:[#allocation5 + $0xe4] ss:$16 sps:$4 sm:$0xff]   ;;  %v1848_v9 = vld [vmem:[#allocation5 + $0xec] ss:$16 sps:$4 sm:$0xff]  }
  0x1f   :  { %163 = vmatpush1.bf16.msra.mxu0 %v137_v6  ;;  %236 = vmatpush1.bf16.msra.mxu1 %v143_v7  ;;  %v1851_v10 = vld [vmem:[#allocation5 + $0xe0] ss:$16 sps:$4 sm:$0xff]   ;;  %v1853_v11 = vld [vmem:[#allocation5 + $0xe8] ss:$16 sps:$4 sm:$0xff]   ;;  %v1856_v12 = vld [vmem:[#allocation5 + $0xc4] ss:$16 sps:$4 sm:$0xff]  }
  0x20   :  { %522 = vmatprep.subr.bf16.mxu0 %v1846_v8  ;;  %563 = vmatprep.subr.bf16.mxu1 %v1848_v9  ;;  %v1860_v13 = vld [vmem:[#allocation5 + $0xcc] ss:$16 sps:$4 sm:$0xff]   ;;  %v1862_v14 = vld [vmem:[#allocation5 + $0xc0] ss:$16 sps:$4 sm:$0xff]   ;;  %v1866_v15 = vld [vmem:[#allocation5 + $0xc8] ss:$16 sps:$4 sm:$0xff]  }
  0x21   :  { %v1590_v16 = vld [vmem:[%s2421_s0 + $0x8] sm:$0xff]   ;;  %v1875_v17 = vld [vmem:[#allocation5 + $0xa4] ss:$16 sps:$4 sm:$0xff]   ;;  %v1879_v19 = vld [vmem:[#allocation5 + $0xa0] ss:$16 sps:$4 sm:$0xff]   ;;  %v67_v44 = vshrl.u32 %v66_v43, 7 }
  0x22   :  { %1485 = vmatmul.mubr.msk.bf16.vlgmr.msra.gmra.mxu0 %vm122_vm1, %v1577_v5  ;;  %1490 = vmatmul.mubr.msk.bf16.vlgmr.msra.gmra.mxu1 %vm122_vm1, %v1577_v5  ;;  %v1877_v18 = vld [vmem:[#allocation5 + $0xac] ss:$16 sps:$4 sm:$0xff]   ;;  %v1881_v20 = vld [vmem:[#allocation5 + $0xa8] ss:$16 sps:$4 sm:$0xff]   ;;  %v1885_v21 = vld [vmem:[#allocation5 + $0x84] ss:$16 sps:$4 sm:$0xff]  }
  0x23   :  { %523 = vmatpush1.bf16.msra.mxu0 %v1851_v10  ;;  %564 = vmatpush1.bf16.msra.mxu1 %v1853_v11  ;;  %v1889_v22 = vld [vmem:[#allocation5 + $0x8c] ss:$16 sps:$4 sm:$0xff]   ;;  %v1893_v23 = vld [vmem:[#allocation5 + $0x80] ss:$16 sps:$4 sm:$0xff]   ;;  %v1897_v24 = vld [vmem:[#allocation5 + $0x88] ss:$16 sps:$4 sm:$0xff]  }
  0x24   :  { %524 = vmatprep.subr.bf16.mxu0 %v1856_v12  ;;  %565 = vmatprep.subr.bf16.mxu1 %v1860_v13  ;;  %v1901_v25 = vld [vmem:[#allocation5 + $0x64] ss:$16 sps:$4 sm:$0xff]   ;;  %v1903_v26 = vld [vmem:[#allocation5 + $0x6c] ss:$16 sps:$4 sm:$0xff]   ;;  %v1912_v28 = vld [vmem:[#allocation5 + $0x60] ss:$16 sps:$4 sm:$0xff]  }
  0x25   :  { %190 = vmatprep.mubr.bf16.mxu0 %v2428_v0  ;;  %263 = vmatprep.mubr.bf16.mxu1 %v2428_v0  ;;  %v1603_v27 = vld [vmem:[%s2421_s0 + $0x10] sm:$0xff]   ;;  %v1914_v29 = vld [vmem:[#allocation5 + $0x68] ss:$16 sps:$4 sm:$0xff]   ;;  %v1920_v31 = vld [vmem:[#allocation5 + $0x4c] ss:$16 sps:$4 sm:$0xff]   ;;  %v76_v45 = vsub.s32 2, %v67_v44 }
  0x26   :  { %v1916_v30 = vld [vmem:[#allocation5 + $0x44] ss:$16 sps:$4 sm:$0xff]   ;;  %v1924_v32 = vld [vmem:[#allocation5 + $0x40] ss:$16 sps:$4 sm:$0xff]   ;;  %v1928_v33 = vld [vmem:[#allocation5 + $0x48] ss:$16 sps:$4 sm:$0xff]  }
  0x27   :  { %525 = vmatpush1.bf16.msra.mxu0 %v1862_v14  ;;  %566 = vmatpush1.bf16.msra.mxu1 %v1866_v15  ;;  %v1930_v34 = vld [vmem:[#allocation5 + $0x24] ss:$16 sps:$4 sm:$0xff]   ;;  %v1616_v35 = vld [vmem:[%s2421_s0 + $0x18] sm:$0xff]   ;;  %v1941_v37 = vld [vmem:[#allocation5 + $0x20] ss:$16 sps:$4 sm:$0xff]   ;;  %v68_v46 = vsub.s32 0, %v67_v44 }
  0x28   :  { %526 = vmatprep.subr.bf16.mxu0 %v1875_v17  ;;  %567 = vmatprep.subr.bf16.mxu1 %v1877_v18  ;;  %v1937_v36 = vld [vmem:[#allocation5 + $0x2c] ss:$16 sps:$4 sm:$0xff]   ;;  %v1943_v38 = vld [vmem:[#allocation5 + $0x28] ss:$16 sps:$4 sm:$0xff]   ;;  %v1945_v39 = vld [vmem:[#allocation5 + $0x4] ss:$16 sps:$4 sm:$0xff]  }
  0x29   :  { %v1947_v40 = vld [vmem:[#allocation5 + $0xc] ss:$16 sps:$4 sm:$0xff]   ;;  %v1953_v41 = vld [vmem:[#allocation5] ss:$16 sps:$4 sm:$0xff]   ;;  %v1955_v42 = vld [vmem:[#allocation5 + $0x8] ss:$16 sps:$4 sm:$0xff]  }
  0x2a   :  { %1486 = vmatmul.mubr.msk.bf16.gmra.mxu0 %vm122_vm1, %v1590_v16  ;;  %1491 = vmatmul.mubr.msk.bf16.gmra.mxu1 %vm122_vm1, %v1590_v16  ;;  %v80_v47 = vsub.s32 3, %v67_v44  ;;  %v64_v48 = vld [vmem:[%s2424_s3] sm:$0xf]  ;;  %v72_v52 = vsub.s32 1, %v67_v44  ;;  %vm1799_vm2 = vmmov 0  }
  0x2b   :  { %527 = vmatpush1.bf16.msra.mxu0 %v1879_v19  ;;  %568 = vmatpush1.bf16.msra.mxu1 %v1881_v20  ;;  %v2012_v51 = vrot.slane %v64_v48, %v76_v45  ;;  %v69_v55 = vrot.slane %v64_v48, %v68_v46 }
  0x2c   :  { %528 = vmatprep.subr.bf16.mxu0 %v1885_v21  ;;  %569 = vmatprep.subr.bf16.mxu1 %v1889_v22  ;;  %v2018_v56 = vrot.slane %v64_v48, %v80_v47  ;;  %v73_v59 = vrot.slane %v64_v48, %v72_v52 }
  0x2d   :  { %200 = vmatprep.mubr.bf16.mxu0 %v2428_v0  ;;  %273 = vmatprep.mubr.bf16.mxu1 %v2428_v0 }
  0x2f   :  { %529 = vmatpush1.bf16.msra.mxu0 %v1893_v23  ;;  %570 = vmatpush1.bf16.msra.mxu1 %v1897_v24 }
  0x30   :  { %530 = vmatprep.subr.bf16.mxu0 %v1901_v25  ;;  %571 = vmatprep.subr.bf16.mxu1 %v1903_v26 }
  0x32   :  { %1487 = vmatmul.mubr.msk.bf16.gmra.mxu0 %vm122_vm1, %v1603_v27  ;;  %1492 = vmatmul.mubr.msk.bf16.gmra.mxu1 %vm122_vm1, %v1603_v27 }
  0x33   :  { %531 = vmatpush1.bf16.msra.mxu0 %v1912_v28  ;;  %572 = vmatpush1.bf16.msra.mxu1 %v1914_v29 }
  0x34   :  { %532 = vmatprep.subr.bf16.mxu0 %v1916_v30  ;;  %573 = vmatprep.subr.bf16.mxu1 %v1920_v31 }
  0x35   :  { %210 = vmatprep.mubr.bf16.mxu0 %v2428_v0  ;;  %283 = vmatprep.mubr.bf16.mxu1 %v2428_v0 }
  0x37   :  { %533 = vmatpush1.bf16.msra.mxu0 %v1924_v32  ;;  %574 = vmatpush1.bf16.msra.mxu1 %v1928_v33 }
  0x38   :  { %534 = vmatprep.subr.bf16.mxu0 %v1930_v34  ;;  %575 = vmatprep.subr.bf16.mxu1 %v1937_v36 }
  0x3a   :  { %1488 = vmatmul.mubr.msk.bf16.gmra.mxu0 %vm122_vm1, %v1616_v35  ;;  %1493 = vmatmul.mubr.msk.bf16.gmra.mxu1 %vm122_vm1, %v1616_v35 }
  0x3b   :  { %535 = vmatpush1.bf16.msra.mxu0 %v1941_v37  ;;  %576 = vmatpush1.bf16.msra.mxu1 %v1943_v38 }
  0x3c   :  { %536 = vmatprep.subr.bf16.mxu0 %v1945_v39  ;;  %577 = vmatprep.subr.bf16.mxu1 %v1947_v40 }
  0x3d   :  { %554 = vmatprep.mubr.bf16.mxu0 %v2428_v0  ;;  %595 = vmatprep.mubr.bf16.mxu1 %v2428_v0 }
  0x3f   :  { %537 = vmatpush1.bf16.msra.mxu0 %v1953_v41  ;;  %578 = vmatpush1.bf16.msra.mxu1 %v1955_v42 }
  0x40   :  { %627 = vmatprep.subr.bf16.mxu0 %v1846_v8  ;;  %668 = vmatprep.subr.bf16.mxu1 %v1848_v9 }
  0x42   :  { %555 = vmatmul.mubr.bf16.vlgmr.msra.gmra.mxu0 %v2428_v0  ;;  %596 = vmatmul.mubr.bf16.vlgmr.msra.gmra.mxu1 %v2428_v0 }
  0x43   :  { %628 = vmatpush1.bf16.msra.mxu0 %v1851_v10  ;;  %669 = vmatpush1.bf16.msra.mxu1 %v1853_v11 }
  0x44   :  { %629 = vmatprep.subr.bf16.mxu0 %v1856_v12  ;;  %670 = vmatprep.subr.bf16.mxu1 %v1860_v13 }
  0x45   :  { %659 = vmatprep.mubr.bf16.mxu0 %v2428_v0  ;;  %700 = vmatprep.mubr.bf16.mxu1 %v2428_v0 }
  0x47   :  { %630 = vmatpush1.bf16.msra.mxu0 %v1862_v14  ;;  %671 = vmatpush1.bf16.msra.mxu1 %v1866_v15 }
  0x48   :  { %631 = vmatprep.subr.bf16.mxu0 %v1875_v17  ;;  %672 = vmatprep.subr.bf16.mxu1 %v1877_v18 }
  0x4b   :  { %632 = vmatpush1.bf16.msra.mxu0 %v1879_v19  ;;  %673 = vmatpush1.bf16.msra.mxu1 %v1881_v20 }
  0x4c   :  { %633 = vmatprep.subr.bf16.mxu0 %v1885_v21  ;;  %674 = vmatprep.subr.bf16.mxu1 %v1889_v22 }
  0x4f   :  { %634 = vmatpush1.bf16.msra.mxu0 %v1893_v23  ;;  %675 = vmatpush1.bf16.msra.mxu1 %v1897_v24 }
  0x50   :  { %635 = vmatprep.subr.bf16.mxu0 %v1901_v25  ;;  %676 = vmatprep.subr.bf16.mxu1 %v1903_v26 }
  0x53   :  { %636 = vmatpush1.bf16.msra.mxu0 %v1912_v28  ;;  %677 = vmatpush1.bf16.msra.mxu1 %v1914_v29 }
  0x54   :  { %637 = vmatprep.subr.bf16.mxu0 %v1916_v30  ;;  %678 = vmatprep.subr.bf16.mxu1 %v1920_v31 }
  0x57   :  { %638 = vmatpush1.bf16.msra.mxu0 %v1924_v32  ;;  %679 = vmatpush1.bf16.msra.mxu1 %v1928_v33 }
  0x58   :  { %639 = vmatprep.subr.bf16.mxu0 %v1930_v34  ;;  %680 = vmatprep.subr.bf16.mxu1 %v1937_v36 }
  0x5b   :  { %640 = vmatpush1.bf16.msra.mxu0 %v1941_v37  ;;  %681 = vmatpush1.bf16.msra.mxu1 %v1943_v38 }
  0x5c   :  { %641 = vmatprep.subr.bf16.mxu0 %v1945_v39  ;;  %682 = vmatprep.subr.bf16.mxu1 %v1947_v40 }
  0x5f   :  { %642 = vmatpush1.bf16.msra.mxu0 %v1953_v41  ;;  %683 = vmatpush1.bf16.msra.mxu1 %v1955_v42 }
  0x60   :  { %732 = vmatprep.subr.bf16.mxu0 %v1846_v8  ;;  %773 = vmatprep.subr.bf16.mxu1 %v1848_v9 }
  0xe2   :  { %v2008_v49 = vpop.f32.mrf.mxu0  ;;  %v2010_v50 = vpop.f32.mrf.mxu1 }
  0xe4   :  { %v2014_v53 = vpop.f32.mrf.mxu0  ;;  %v2016_v54 = vpop.f32.mrf.mxu1 }
  0xe6   :  { %v186_v57 = vpop.f32.mrf.mxu0  ;;  %v259_v58 = vpop.f32.mrf.mxu1 }
  0xe7   :  { %v2020_v60 = vadd.f32 %v186_v57, %v69_v55  ;;  %v2023_v61 = vadd.f32 %v259_v58, %v2012_v51 }
  0xe8   :  { %v188_v62 = vpop.f32.mrf.mxu0  ;;  %v261_v63 = vpop.f32.mrf.mxu1 }
  0xe9   :  { %v2025_v1 = vadd.f32 %v188_v62, %v73_v59  ;;  %v2028_v2 = vadd.f32 %v261_v63, %v2018_v56 }
  0xea   :  { %v192_v3 = vpop.f32.mrf.mxu0  ;;  %v265_v4 = vpop.f32.mrf.mxu1 }
  0xeb   :  { %v2030_v5 = vadd.f32 %v192_v3, %v69_v55  ;;  %v2033_v6 = vadd.f32 %v265_v4, %v2012_v51 }
  0xec   :  { %v194_v7 = vpop.f32.mrf.mxu0  ;;  %v267_v16 = vpop.f32.mrf.mxu1 }
  0xed   :  { %v2035_v27 = vadd.f32 %v194_v7, %v73_v59  ;;  %v2038_v35 = vadd.f32 %v267_v16, %v2018_v56 }
  0xee   :  { %v196_v43 = vpop.f32.mrf.mxu0  ;;  %v269_v44 = vpop.f32.mrf.mxu1 }
  0xef   :  { %v2040_v45 = vadd.f32 %v196_v43, %v69_v55  ;;  %v2043_v46 = vadd.f32 %v269_v44, %v2012_v51 }
  0xf0   :  { %v198_v47 = vpop.f32.mrf.mxu0  ;;  %v271_v48 = vpop.f32.mrf.mxu1 }
  0xf1   :  { %2430 = vst [vmem:[#allocation9_spill] sm:$0xff] %v2040_v45  ;;  %2431 = vst [vmem:[#allocation10_spill] sm:$0xff] %v2043_v46  ;;  %v2045_v52 = vadd.f32 %v198_v47, %v73_v59  ;;  %v2048_v57 = vadd.f32 %v271_v48, %v2018_v56  ;;  %v256_v45 = vadd.f32 %v2010_v50, %v2012_v51 }
  0xf2   :  { %v202_v58 = vpop.f32.mrf.mxu0  ;;  %v275_v62 = vpop.f32.mrf.mxu1 }
  0xf3   :  { %2432 = vst [vmem:[#allocation11_spill] sm:$0xff] %v2045_v52  ;;  %2433 = vst [vmem:[#allocation12_spill] sm:$0xff] %v2048_v57  ;;  %v2050_v63 = vadd.f32 %v202_v58, %v69_v55  ;;  %v2053_v3 = vadd.f32 %v275_v62, %v2012_v51 }
  0xf4   :  { %v204_v4 = vpop.f32.mrf.mxu0  ;;  %v277_v7 = vpop.f32.mrf.mxu1 }
  0xf5   :  { %2434 = vst [vmem:[#allocation13_spill] sm:$0xff] %v2050_v63  ;;  %2435 = vst [vmem:[#allocation14_spill] sm:$0xff] %v2053_v3  ;;  %v2055_v16 = vadd.f32 %v204_v4, %v73_v59  ;;  %v2058_v43 = vadd.f32 %v277_v7, %v2018_v56 }
  0xf6   :  { %v206_v44 = vpop.f32.mrf.mxu0  ;;  %v279_v47 = vpop.f32.mrf.mxu1 }
  0xf7   :  { %2436 = vst [vmem:[#allocation15_spill] sm:$0xff] %v2055_v16  ;;  %2437 = vst [vmem:[#allocation16_spill] sm:$0xff] %v2058_v43  ;;  %v2060_v0 = vadd.f32 %v206_v44, %v69_v55  ;;  %v2063_v48 = vadd.f32 %v279_v47, %v2012_v51 }
  0xf8   :  { %v208_v57 = vpop.f32.mrf.mxu0  ;;  %v281_v58 = vpop.f32.mrf.mxu1 }
  0xf9   :  { %2438 = vst [vmem:[#allocation17_spill] sm:$0xff] %v2060_v0  ;;  %2439 = vst [vmem:[#allocation18_spill] sm:$0xff] %v2063_v48  ;;  %v2065_v63 = vadd.f32 %v208_v57, %v73_v59  ;;  %v2068_v62 = vadd.f32 %v281_v58, %v2018_v56 }
  0xfa   :  { %v212_v3 = vpop.f32.mrf.mxu0  ;;  %v285_v4 = vpop.f32.mrf.mxu1 }
  0xfb   :  { %2440 = vst [vmem:[#allocation19_spill] sm:$0xff] %v2065_v63  ;;  %2441 = vst [vmem:[#allocation20_spill] sm:$0xff] %v2068_v62  ;;  %v2070_v16 = vadd.f32 %v212_v3, %v69_v55  ;;  %v2073_v7 = vadd.f32 %v285_v4, %v2012_v51 }
  0xfc   :  { %v214_v43 = vpop.f32.mrf.mxu0  ;;  %v287_v44 = vpop.f32.mrf.mxu1 }
  0xfd   :  { %2442 = vst [vmem:[#allocation21_spill] sm:$0xff] %v2070_v16  ;;  %2443 = vst [vmem:[#allocation22_spill] sm:$0xff] %v2073_v7  ;;  %v2075_v0 = vadd.f32 %v214_v43, %v73_v59  ;;  %v2078_v47 = vadd.f32 %v287_v44, %v2018_v56  ;;  %v183_v16 = vadd.f32 %v2008_v49, %v69_v55 }
  0xfe   :  { %v216_v48 = vpop.f32.mrf.mxu0  ;;  %v289_v57 = vpop.f32.mrf.mxu1  ;;  %v185_v44 = vadd.f32 %v2014_v53, %v73_v59 }
  0xff   :  { %2444 = vst [vmem:[#allocation23_spill] sm:$0xff] %v2075_v0  ;;  %2445 = vst [vmem:[#allocation24_spill] sm:$0xff] %v2078_v47  ;;  %v2080_v63 = vadd.f32 %v216_v48, %v69_v55  ;;  %v2083_v58 = vadd.f32 %v289_v57, %v2012_v51 }
 0x100   :  { %v218_v62 = vpop.f32.mrf.mxu0  ;;  %v291_v3 = vpop.f32.mrf.mxu1 }
 0x101   :  { %2446 = vst [vmem:[#allocation25_spill] sm:$0xff] %v2080_v63  ;;  %2447 = vst [vmem:[#allocation26_spill] sm:$0xff] %v2083_v58  ;;  %v2086_v4 = vadd.f32 %v218_v62, %v73_v59  ;;  %v2089_v7 = vadd.f32 %v291_v3, %v2018_v56 }
 0x102   :  { %v556_v43 = vpop.f32.mrf.mxu0  ;;  %v597_v0 = vpop.f32.mrf.mxu1 }
 0x103   :  { %2448 = vst [vmem:[#allocation27_spill] sm:$0xff] %v2089_v7  ;;  %v557_v47 = vadd.f32 %v556_v43, %v183_v16  ;;  %v598_v3 = vadd.f32 %v597_v0, %v256_v45  ;;  %v258_v7 = vadd.f32 %v2016_v54, %v2018_v56 }
 0x104   :  { %v558_v46 = vpop.f32.mrf.mxu0  ;;  %v599_v48 = vpop.f32.mrf.mxu1 }
 0x105   :  { %v604_v63 = vmul.f32 0.5, %v557_v47  ;;  %v559_v52 = vadd.f32 %v558_v46, %v185_v44  ;;  %v600_v53 = vadd.f32 %v599_v48, %v258_v7 }
 0x106   :  { %v560_v57 = vpop.f32.mrf.mxu0  ;;  %v601_v58 = vpop.f32.mrf.mxu1 }
 0x107   :  { %1637 = vtanh.f32 %v604_v63  ;;  %v608_v49 = vmul.f32 0.5, %v559_v52  ;;  %v613_v59 = vmul.f32 0.5, %v600_v53  ;;  %v2449_v57 = vmov 0  }
 0x108   :  { %v561_v55 = vpop.f32.mrf.mxu0  ;;  %v602_v62 = vpop.f32.mrf.mxu1 }
 0x109   :  { %1639 = vtanh.f32 %v608_v49 }
 0x10a   :  { %1641 = vtanh.f32 %v598_v3 }
 0x10b   :  { %1643 = vtanh.f32 %v613_v59 }
 0x114   :  { %v1638_v16 = vpop.eup %1637 }
 0x115   :  { %v606_v47 = vmul.f32 0.5, %v1638_v16 }
 0x116   :  { %v1640_v46 = vpop.eup %1639 }
 0x117   :  { %v607_v43 = vadd.f32 0.5, %v606_v47  ;;  %v610_v58 = vmul.f32 0.5, %v1640_v46  ;;  %v1642_v50 = vpop.eup %1641 }
 0x118   :  { %v1644_v0 = vpop.eup %1643 }
 0x119   :  { %v611_v44 = vadd.f32 0.5, %v610_v58  ;;  %v618_v52 = vmul.f32 %v1642_v50, %v607_v43  ;;  %v615_v45 = vmul.f32 0.5, %v1644_v0 }
 0x11b   :  { %v617_v51 = vmul.f32 0.0, %v611_v44  ;;  %v616_v54 = vadd.f32 0.5, %v615_v45 }
 0x11d   :  { %v2096_v63 = vadd.f32 %v618_v52, %v617_v51 }
 0x11f   :  { %1645 = vtanh.f32 %v2096_v63 }
 0x12c   :  { %v1646_v56 = vpop.eup %1645 }
 0x12d   :  { %v621_v7 = vmul.f32 %v1646_v56, %v616_v54 }
 0x12f   :  { %v622_v48 = vpack.c.bf16 %v621_v7, %v621_v7 }
 0x131   :  { %660 = vmatmul.mubr.bf16.vlgmr.msra.gmra.mxu0 %v622_v48  ;;  %701 = vmatmul.mubr.bf16.vlgmr.msra.gmra.mxu1 %v622_v48 }
 0x132   :  { %733 = vmatpush1.bf16.msra.mxu0 %v1851_v10  ;;  %774 = vmatpush1.bf16.msra.mxu1 %v1853_v11 }
 0x133   :  { %734 = vmatprep.subr.bf16.mxu0 %v1856_v12  ;;  %775 = vmatprep.subr.bf16.mxu1 %v1860_v13 }
 0x134   :  { %764 = vmatprep.mubr.bf16.mxu0 %v2449_v57  ;;  %805 = vmatprep.mubr.bf16.mxu1 %v2449_v57 }
 0x136   :  { %735 = vmatpush1.bf16.msra.mxu0 %v1862_v14  ;;  %776 = vmatpush1.bf16.msra.mxu1 %v1866_v15 }
 0x137   :  { %736 = vmatprep.subr.bf16.mxu0 %v1875_v17  ;;  %777 = vmatprep.subr.bf16.mxu1 %v1877_v18 }
 0x13a   :  { %737 = vmatpush1.bf16.msra.mxu0 %v1879_v19  ;;  %778 = vmatpush1.bf16.msra.mxu1 %v1881_v20 }
 0x13b   :  { %738 = vmatprep.subr.bf16.mxu0 %v1885_v21  ;;  %779 = vmatprep.subr.bf16.mxu1 %v1889_v22 }
 0x13e   :  { %739 = vmatpush1.bf16.msra.mxu0 %v1893_v23  ;;  %780 = vmatpush1.bf16.msra.mxu1 %v1897_v24 }
 0x13f   :  { %740 = vmatprep.subr.bf16.mxu0 %v1901_v25  ;;  %781 = vmatprep.subr.bf16.mxu1 %v1903_v26 }
 0x142   :  { %741 = vmatpush1.bf16.msra.mxu0 %v1912_v28  ;;  %782 = vmatpush1.bf16.msra.mxu1 %v1914_v29 }
 0x143   :  { %742 = vmatprep.subr.bf16.mxu0 %v1916_v30  ;;  %783 = vmatprep.subr.bf16.mxu1 %v1920_v31 }
 0x146   :  { %743 = vmatpush1.bf16.msra.mxu0 %v1924_v32  ;;  %784 = vmatpush1.bf16.msra.mxu1 %v1928_v33 }
 0x147   :  { %744 = vmatprep.subr.bf16.mxu0 %v1930_v34  ;;  %785 = vmatprep.subr.bf16.mxu1 %v1937_v36 }
 0x14a   :  { %745 = vmatpush1.bf16.msra.mxu0 %v1941_v37  ;;  %786 = vmatpush1.bf16.msra.mxu1 %v1943_v38 }
 0x14b   :  { %746 = vmatprep.subr.bf16.mxu0 %v1945_v39  ;;  %787 = vmatprep.subr.bf16.mxu1 %v1947_v40 }
 0x14e   :  { %747 = vmatpush1.bf16.msra.mxu0 %v1953_v41  ;;  %788 = vmatpush1.bf16.msra.mxu1 %v1955_v42 }
 0x14f   :  { %837 = vmatprep.subr.bf16.mxu0 %v1846_v8  ;;  %878 = vmatprep.subr.bf16.mxu1 %v1848_v9 }
 0x1f1   :  { %v661_v49 = vpop.f32.mrf.mxu0  ;;  %v702_v55 = vpop.f32.mrf.mxu1 }
 0x1f2   :  { %v662_v62 = vadd.f32 %v661_v49, %v2020_v60  ;;  %v703_v43 = vadd.f32 %v702_v55, %v2023_v61 }
 0x1f3   :  { %v663_v3 = vpop.f32.mrf.mxu0  ;;  %v704_v53 = vpop.f32.mrf.mxu1 }
 0x1f4   :  { %v709_v59 = vmul.f32 0.5, %v662_v62  ;;  %v664_v16 = vadd.f32 %v663_v3, %v2025_v1  ;;  %v705_v51 = vadd.f32 %v704_v53, %v2028_v2 }
 0x1f5   :  { %v665_v47 = vpop.f32.mrf.mxu0  ;;  %v706_v46 = vpop.f32.mrf.mxu1 }
 0x1f6   :  { %1647 = vtanh.f32 %v709_v59  ;;  %v713_v58 = vmul.f32 0.5, %v664_v16  ;;  %v718_v52 = vmul.f32 0.5, %v705_v51 }
 0x1f7   :  { %v666_v44 = vpop.f32.mrf.mxu0  ;;  %v707_v50 = vpop.f32.mrf.mxu1 }
 0x1f8   :  { %1649 = vtanh.f32 %v713_v58 }
 0x1f9   :  { %1651 = vtanh.f32 %v703_v43 }
 0x1fa   :  { %1653 = vtanh.f32 %v718_v52 }
 0x203   :  { %v1648_v0 = vpop.eup %1647 }
 0x204   :  { %v711_v60 = vmul.f32 0.5, %v1648_v0 }
 0x205   :  { %v1650_v45 = vpop.eup %1649 }
 0x206   :  { %v712_v54 = vadd.f32 0.5, %v711_v60  ;;  %v715_v56 = vmul.f32 0.5, %v1650_v45  ;;  %v1652_v1 = vpop.eup %1651 }
 0x207   :  { %v1654_v55 = vpop.eup %1653 }
 0x208   :  { %v716_v7 = vadd.f32 0.5, %v715_v56  ;;  %v723_v48 = vmul.f32 %v1652_v1, %v712_v54  ;;  %v720_v62 = vmul.f32 0.5, %v1654_v55 }
 0x20a   :  { %v722_v49 = vmul.f32 %v716_v7, %v2096_v63  ;;  %v721_v3 = vadd.f32 0.5, %v720_v62 }
 0x20c   :  { %v2138_v61 = vadd.f32 %v723_v48, %v722_v49 }
 0x20e   :  { %1655 = vtanh.f32 %v2138_v61 }
 0x21b   :  { %v1656_v2 = vpop.eup %1655 }
 0x21c   :  { %v726_v53 = vmul.f32 %v1656_v2, %v721_v3 }
 0x21e   :  { %v727_v59 = vpack.c.bf16 %v726_v53, %v726_v53 }
 0x220   :  { %765 = vmatmul.mubr.bf16.vlgmr.msra.gmra.mxu0 %v727_v59  ;;  %806 = vmatmul.mubr.bf16.vlgmr.msra.gmra.mxu1 %v727_v59 }
 0x221   :  { %838 = vmatpush1.bf16.msra.mxu0 %v1851_v10  ;;  %879 = vmatpush1.bf16.msra.mxu1 %v1853_v11 }
 0x222   :  { %839 = vmatprep.subr.bf16.mxu0 %v1856_v12  ;;  %880 = vmatprep.subr.bf16.mxu1 %v1860_v13 }
 0x223   :  { %869 = vmatprep.mubr.bf16.mxu0 %v2449_v57  ;;  %910 = vmatprep.mubr.bf16.mxu1 %v2449_v57 }
 0x225   :  { %840 = vmatpush1.bf16.msra.mxu0 %v1862_v14  ;;  %881 = vmatpush1.bf16.msra.mxu1 %v1866_v15 }
 0x226   :  { %841 = vmatprep.subr.bf16.mxu0 %v1875_v17  ;;  %882 = vmatprep.subr.bf16.mxu1 %v1877_v18 }
 0x229   :  { %842 = vmatpush1.bf16.msra.mxu0 %v1879_v19  ;;  %883 = vmatpush1.bf16.msra.mxu1 %v1881_v20 }
 0x22a   :  { %843 = vmatprep.subr.bf16.mxu0 %v1885_v21  ;;  %884 = vmatprep.subr.bf16.mxu1 %v1889_v22 }
 0x22d   :  { %844 = vmatpush1.bf16.msra.mxu0 %v1893_v23  ;;  %885 = vmatpush1.bf16.msra.mxu1 %v1897_v24 }
 0x22e   :  { %845 = vmatprep.subr.bf16.mxu0 %v1901_v25  ;;  %886 = vmatprep.subr.bf16.mxu1 %v1903_v26 }
 0x231   :  { %846 = vmatpush1.bf16.msra.mxu0 %v1912_v28  ;;  %887 = vmatpush1.bf16.msra.mxu1 %v1914_v29 }
 0x232   :  { %847 = vmatprep.subr.bf16.mxu0 %v1916_v30  ;;  %888 = vmatprep.subr.bf16.mxu1 %v1920_v31 }
 0x235   :  { %848 = vmatpush1.bf16.msra.mxu0 %v1924_v32  ;;  %889 = vmatpush1.bf16.msra.mxu1 %v1928_v33 }
 0x236   :  { %849 = vmatprep.subr.bf16.mxu0 %v1930_v34  ;;  %890 = vmatprep.subr.bf16.mxu1 %v1937_v36 }
 0x239   :  { %850 = vmatpush1.bf16.msra.mxu0 %v1941_v37  ;;  %891 = vmatpush1.bf16.msra.mxu1 %v1943_v38 }
 0x23a   :  { %851 = vmatprep.subr.bf16.mxu0 %v1945_v39  ;;  %892 = vmatprep.subr.bf16.mxu1 %v1947_v40 }
 0x23d   :  { %852 = vmatpush1.bf16.msra.mxu0 %v1953_v41  ;;  %893 = vmatpush1.bf16.msra.mxu1 %v1955_v42 }
 0x23e   :  { %942 = vmatprep.subr.bf16.mxu0 %v1846_v8  ;;  %983 = vmatprep.subr.bf16.mxu1 %v1848_v9 }
 0x2e0   :  { %v766_v63 = vpop.f32.mrf.mxu0  ;;  %v807_v16 = vpop.f32.mrf.mxu1 }
 0x2e1   :  { %v767_v47 = vadd.f32 %v766_v63, %v2030_v5  ;;  %v808_v52 = vadd.f32 %v807_v16, %v2033_v6 }
 0x2e2   :  { %v768_v46 = vpop.f32.mrf.mxu0  ;;  %v809_v43 = vpop.f32.mrf.mxu1 }
 0x2e3   :  { %v814_v58 = vmul.f32 0.5, %v767_v47  ;;  %v769_v44 = vadd.f32 %v768_v46, %v2035_v27  ;;  %v810_v54 = vadd.f32 %v809_v43, %v2038_v35  ;;  %v2450_v46 = vld [vmem:[#allocation9_spill] sm:$0xff] }
 0x2e4   :  { %v770_v50 = vpop.f32.mrf.mxu0  ;;  %v811_v51 = vpop.f32.mrf.mxu1 }
 0x2e5   :  { %1657 = vtanh.f32 %v814_v58  ;;  %v818_v0 = vmul.f32 0.5, %v769_v44  ;;  %v823_v56 = vmul.f32 0.5, %v810_v54  ;;  %v2451_v51 = vld [vmem:[#allocation11_spill] sm:$0xff] }
 0x2e6   :  { %v771_v60 = vpop.f32.mrf.mxu0  ;;  %v812_v45 = vpop.f32.mrf.mxu1 }
 0x2e7   :  { %1659 = vtanh.f32 %v818_v0  ;;  %v2452_v45 = vld [vmem:[#allocation10_spill] sm:$0xff] }
 0x2e8   :  { %1661 = vtanh.f32 %v808_v52 }
 0x2e9   :  { %1663 = vtanh.f32 %v823_v56 }
 0x2f2   :  { %v1658_v1 = vpop.eup %1657 }
 0x2f3   :  { %v816_v5 = vmul.f32 0.5, %v1658_v1 }
 0x2f4   :  { %v1660_v7 = vpop.eup %1659 }
 0x2f5   :  { %v817_v48 = vadd.f32 0.5, %v816_v5  ;;  %v820_v49 = vmul.f32 0.5, %v1660_v7  ;;  %v1662_v27 = vpop.eup %1661 }
 0x2f6   :  { %v1664_v2 = vpop.eup %1663 }
 0x2f7   :  { %v821_v55 = vadd.f32 0.5, %v820_v49  ;;  %v828_v62 = vmul.f32 %v1662_v27, %v817_v48  ;;  %v825_v53 = vmul.f32 0.5, %v1664_v2 }
 0x2f9   :  { %v827_v3 = vmul.f32 %v821_v55, %v2138_v61  ;;  %v826_v59 = vadd.f32 0.5, %v825_v53 }
 0x2fb   :  { %v2180_v6 = vadd.f32 %v828_v62, %v827_v3 }
 0x2fd   :  { %1665 = vtanh.f32 %v2180_v6 }
 0x30a   :  { %v1666_v35 = vpop.eup %1665 }
 0x30b   :  { %v831_v63 = vmul.f32 %v1666_v35, %v826_v59 }
 0x30d   :  { %v832_v16 = vpack.c.bf16 %v831_v63, %v831_v63 }
 0x30f   :  { %870 = vmatmul.mubr.bf16.vlgmr.msra.gmra.mxu0 %v832_v16  ;;  %911 = vmatmul.mubr.bf16.vlgmr.msra.gmra.mxu1 %v832_v16 }
 0x310   :  { %943 = vmatpush1.bf16.msra.mxu0 %v1851_v10  ;;  %984 = vmatpush1.bf16.msra.mxu1 %v1853_v11 }
 0x311   :  { %944 = vmatprep.subr.bf16.mxu0 %v1856_v12  ;;  %985 = vmatprep.subr.bf16.mxu1 %v1860_v13 }
 0x312   :  { %974 = vmatprep.mubr.bf16.mxu0 %v2449_v57  ;;  %1015 = vmatprep.mubr.bf16.mxu1 %v2449_v57 }
 0x314   :  { %945 = vmatpush1.bf16.msra.mxu0 %v1862_v14  ;;  %986 = vmatpush1.bf16.msra.mxu1 %v1866_v15 }
 0x315   :  { %946 = vmatprep.subr.bf16.mxu0 %v1875_v17  ;;  %987 = vmatprep.subr.bf16.mxu1 %v1877_v18 }
 0x318   :  { %947 = vmatpush1.bf16.msra.mxu0 %v1879_v19  ;;  %988 = vmatpush1.bf16.msra.mxu1 %v1881_v20 }
 0x319   :  { %948 = vmatprep.subr.bf16.mxu0 %v1885_v21  ;;  %989 = vmatprep.subr.bf16.mxu1 %v1889_v22 }
 0x31c   :  { %949 = vmatpush1.bf16.msra.mxu0 %v1893_v23  ;;  %990 = vmatpush1.bf16.msra.mxu1 %v1897_v24 }
 0x31d   :  { %950 = vmatprep.subr.bf16.mxu0 %v1901_v25  ;;  %991 = vmatprep.subr.bf16.mxu1 %v1903_v26 }
 0x320   :  { %951 = vmatpush1.bf16.msra.mxu0 %v1912_v28  ;;  %992 = vmatpush1.bf16.msra.mxu1 %v1914_v29 }
 0x321   :  { %952 = vmatprep.subr.bf16.mxu0 %v1916_v30  ;;  %993 = vmatprep.subr.bf16.mxu1 %v1920_v31 }
 0x324   :  { %953 = vmatpush1.bf16.msra.mxu0 %v1924_v32  ;;  %994 = vmatpush1.bf16.msra.mxu1 %v1928_v33 }
 0x325   :  { %954 = vmatprep.subr.bf16.mxu0 %v1930_v34  ;;  %995 = vmatprep.subr.bf16.mxu1 %v1937_v36 }
 0x328   :  { %955 = vmatpush1.bf16.msra.mxu0 %v1941_v37  ;;  %996 = vmatpush1.bf16.msra.mxu1 %v1943_v38 }
 0x329   :  { %956 = vmatprep.subr.bf16.mxu0 %v1945_v39  ;;  %997 = vmatprep.subr.bf16.mxu1 %v1947_v40 }
 0x32c   :  { %957 = vmatpush1.bf16.msra.mxu0 %v1953_v41  ;;  %998 = vmatpush1.bf16.msra.mxu1 %v1955_v42 }
 0x32d   :  { %1047 = vmatprep.subr.bf16.mxu0 %v1846_v8  ;;  %1088 = vmatprep.subr.bf16.mxu1 %v1848_v9  ;;  %v2453_v8 = vld [vmem:[#allocation12_spill] sm:$0xff] }
 0x3cf   :  { %v871_v61 = vpop.f32.mrf.mxu0  ;;  %v912_v47 = vpop.f32.mrf.mxu1 }
 0x3d0   :  { %v872_v43 = vadd.f32 %v871_v61, %v2450_v46  ;;  %v913_v54 = vadd.f32 %v912_v47, %v2452_v45 }
 0x3d1   :  { %v873_v58 = vpop.f32.mrf.mxu0  ;;  %v914_v44 = vpop.f32.mrf.mxu1 }
 0x3d2   :  { %v919_v50 = vmul.f32 0.5, %v872_v43  ;;  %v874_v52 = vadd.f32 %v873_v58, %v2451_v51  ;;  %v915_v9 = vadd.f32 %v914_v44, %v2453_v8 }
 0x3d3   :  { %v875_v0 = vpop.f32.mrf.mxu0  ;;  %v916_v60 = vpop.f32.mrf.mxu1 }
 0x3d4   :  { %1667 = vtanh.f32 %v919_v50  ;;  %v923_v56 = vmul.f32 0.5, %v874_v52  ;;  %v928_v7 = vmul.f32 0.5, %v915_v9 }
 0x3d5   :  { %v876_v1 = vpop.f32.mrf.mxu0  ;;  %v917_v5 = vpop.f32.mrf.mxu1 }
 0x3d6   :  { %1669 = vtanh.f32 %v923_v56 }
 0x3d7   :  { %1671 = vtanh.f32 %v913_v54 }
 0x3d8   :  { %1673 = vtanh.f32 %v928_v7 }
 0x3e1   :  { %v1668_v48 = vpop.eup %1667 }
 0x3e2   :  { %v921_v49 = vmul.f32 0.5, %v1668_v48  ;;  %v2271_v48 = vld [vmem:[#allocation5 + $0xe0] ss:$16 sps:$4 sm:$0xff]  }
 0x3e3   :  { %v1670_v27 = vpop.eup %1669 }
 0x3e4   :  { %v922_v55 = vadd.f32 0.5, %v921_v49  ;;  %v925_v62 = vmul.f32 0.5, %v1670_v27  ;;  %v1672_v3 = vpop.eup %1671  ;;  %v2274_v49 = vld [vmem:[#allocation5 + $0xe8] ss:$16 sps:$4 sm:$0xff]   ;;  %v2277_v27 = vld [vmem:[#allocation5 + $0xc4] ss:$16 sps:$4 sm:$0xff]  }
 0x3e5   :  { %v1674_v63 = vpop.eup %1673 }
 0x3e6   :  { %v926_v2 = vadd.f32 0.5, %v925_v62  ;;  %v933_v53 = vmul.f32 %v1672_v3, %v922_v55  ;;  %v930_v16 = vmul.f32 0.5, %v1674_v63  ;;  %v2280_v55 = vld [vmem:[#allocation5 + $0xcc] ss:$16 sps:$4 sm:$0xff]   ;;  %v2285_v62 = vld [vmem:[#allocation5 + $0xc0] ss:$16 sps:$4 sm:$0xff]  }
 0x3e7   :  { %v2288_v3 = vld [vmem:[#allocation5 + $0xc8] ss:$16 sps:$4 sm:$0xff]   ;;  %v2303_v63 = vld [vmem:[#allocation5 + $0x84] ss:$16 sps:$4 sm:$0xff]  }
 0x3e8   :  { %v932_v59 = vmul.f32 %v926_v2, %v2180_v6  ;;  %v931_v61 = vadd.f32 0.5, %v930_v16  ;;  %v2291_v2 = vld [vmem:[#allocation5 + $0xa4] ss:$16 sps:$4 sm:$0xff]   ;;  %v2306_v16 = vld [vmem:[#allocation5 + $0x8c] ss:$16 sps:$4 sm:$0xff]  }
 0x3ea   :  { %v2222_v35 = vadd.f32 %v933_v53, %v932_v59  ;;  %v2294_v53 = vld [vmem:[#allocation5 + $0xac] ss:$16 sps:$4 sm:$0xff]   ;;  %v2297_v59 = vld [vmem:[#allocation5 + $0xa0] ss:$16 sps:$4 sm:$0xff]  }
 0x3ec   :  { %1675 = vtanh.f32 %v2222_v35 }
 0x3f9   :  { %v1676_v47 = vpop.eup %1675 }
 0x3fa   :  { %v936_v46 = vmul.f32 %v1676_v47, %v931_v61  ;;  %v2309_v61 = vld [vmem:[#allocation5 + $0x80] ss:$16 sps:$4 sm:$0xff]   ;;  %v2312_v47 = vld [vmem:[#allocation5 + $0x88] ss:$16 sps:$4 sm:$0xff]  }
 0x3fc   :  { %v937_v43 = vpack.c.bf16 %v936_v46, %v936_v46  ;;  %v2315_v46 = vld [vmem:[#allocation5 + $0x64] ss:$16 sps:$4 sm:$0xff]  }
 0x3fe   :  { %975 = vmatmul.mubr.bf16.vlgmr.msra.gmra.mxu0 %v937_v43  ;;  %1016 = vmatmul.mubr.bf16.vlgmr.msra.gmra.mxu1 %v937_v43  ;;  %v2318_v43 = vld [vmem:[#allocation5 + $0x6c] ss:$16 sps:$4 sm:$0xff]  }
 0x3ff   :  { %1048 = vmatpush1.bf16.msra.mxu0 %v1851_v10  ;;  %1089 = vmatpush1.bf16.msra.mxu1 %v1853_v11  ;;  %v2257_v10 = vld [vmem:[#allocation5 + $0xe4] ss:$16 sps:$4 sm:$0xff]   ;;  %v2260_v11 = vld [vmem:[#allocation5 + $0xec] ss:$16 sps:$4 sm:$0xff]  }
 0x400   :  { %1049 = vmatprep.subr.bf16.mxu0 %v1856_v12  ;;  %1090 = vmatprep.subr.bf16.mxu1 %v1860_v13 }
 0x401   :  { %1079 = vmatprep.mubr.bf16.mxu0 %v2449_v57  ;;  %1120 = vmatprep.mubr.bf16.mxu1 %v2449_v57 }
 0x403   :  { %1050 = vmatpush1.bf16.msra.mxu0 %v1862_v14  ;;  %1091 = vmatpush1.bf16.msra.mxu1 %v1866_v15  ;;  %v2454_v14 = vld [vmem:[#allocation13_spill] sm:$0xff] }
 0x404   :  { %1051 = vmatprep.subr.bf16.mxu0 %v1875_v17  ;;  %1092 = vmatprep.subr.bf16.mxu1 %v1877_v18 }
 0x407   :  { %1052 = vmatpush1.bf16.msra.mxu0 %v1879_v19  ;;  %1093 = vmatpush1.bf16.msra.mxu1 %v1881_v20  ;;  %v2455_v20 = vld [vmem:[#allocation15_spill] sm:$0xff] }
 0x408   :  { %1053 = vmatprep.subr.bf16.mxu0 %v1885_v21  ;;  %1094 = vmatprep.subr.bf16.mxu1 %v1889_v22 }
 0x40b   :  { %1054 = vmatpush1.bf16.msra.mxu0 %v1893_v23  ;;  %1095 = vmatpush1.bf16.msra.mxu1 %v1897_v24  ;;  %v2456_v24 = vld [vmem:[#allocation14_spill] sm:$0xff] }
 0x40c   :  { %1055 = vmatprep.subr.bf16.mxu0 %v1901_v25  ;;  %1096 = vmatprep.subr.bf16.mxu1 %v1903_v26 }
 0x40f   :  { %1056 = vmatpush1.bf16.msra.mxu0 %v1912_v28  ;;  %1097 = vmatpush1.bf16.msra.mxu1 %v1914_v29 }
 0x410   :  { %1057 = vmatprep.subr.bf16.mxu0 %v1916_v30  ;;  %1098 = vmatprep.subr.bf16.mxu1 %v1920_v31  ;;  %v2457_v30 = vld [vmem:[#allocation16_spill] sm:$0xff] }
 0x413   :  { %1058 = vmatpush1.bf16.msra.mxu0 %v1924_v32  ;;  %1099 = vmatpush1.bf16.msra.mxu1 %v1928_v33 }
 0x414   :  { %1059 = vmatprep.subr.bf16.mxu0 %v1930_v34  ;;  %1100 = vmatprep.subr.bf16.mxu1 %v1937_v36 }
 0x417   :  { %1060 = vmatpush1.bf16.msra.mxu0 %v1941_v37  ;;  %1101 = vmatpush1.bf16.msra.mxu1 %v1943_v38 }
 0x418   :  { %1061 = vmatprep.subr.bf16.mxu0 %v1945_v39  ;;  %1102 = vmatprep.subr.bf16.mxu1 %v1947_v40 }
 0x41b   :  { %1062 = vmatpush1.bf16.msra.mxu0 %v1953_v41  ;;  %1103 = vmatpush1.bf16.msra.mxu1 %v1955_v42 }
 0x41c   :  { %1152 = vmatprep.subr.bf16.mxu0 %v2257_v10  ;;  %1193 = vmatprep.subr.bf16.mxu1 %v2260_v11 }
 0x4be   :  { %v976_v12 = vpop.f32.mrf.mxu0  ;;  %v1017_v13 = vpop.f32.mrf.mxu1 }
 0x4bf   :  { %v977_v15 = vadd.f32 %v976_v12, %v2454_v14  ;;  %v1018_v25 = vadd.f32 %v1017_v13, %v2456_v24  ;;  %v2321_v12 = vld [vmem:[#allocation5 + $0x60] ss:$16 sps:$4 sm:$0xff]   ;;  %v2324_v13 = vld [vmem:[#allocation5 + $0x68] ss:$16 sps:$4 sm:$0xff]   ;;  %v2327_v14 = vld [vmem:[#allocation5 + $0x44] ss:$16 sps:$4 sm:$0xff]  }
 0x4c0   :  { %v978_v17 = vpop.f32.mrf.mxu0  ;;  %v1019_v18 = vpop.f32.mrf.mxu1 }
 0x4c1   :  { %v1024_v19 = vmul.f32 0.5, %v977_v15  ;;  %v979_v21 = vadd.f32 %v978_v17, %v2455_v20  ;;  %v1020_v31 = vadd.f32 %v1019_v18, %v2457_v30  ;;  %v2330_v15 = vld [vmem:[#allocation5 + $0x4c] ss:$16 sps:$4 sm:$0xff]   ;;  %v2333_v17 = vld [vmem:[#allocation5 + $0x40] ss:$16 sps:$4 sm:$0xff]  }
 0x4c2   :  { %v980_v22 = vpop.f32.mrf.mxu0  ;;  %v1021_v23 = vpop.f32.mrf.mxu1  ;;  %v2458_v18 = vld [vmem:[#allocation17_spill] sm:$0xff] }
 0x4c3   :  { %1677 = vtanh.f32 %v1024_v19  ;;  %v1028_v26 = vmul.f32 0.5, %v979_v21  ;;  %v1033_v32 = vmul.f32 0.5, %v1020_v31 }
 0x4c4   :  { %v981_v28 = vpop.f32.mrf.mxu0  ;;  %v1022_v29 = vpop.f32.mrf.mxu1 }
 0x4c5   :  { %1679 = vtanh.f32 %v1028_v26 }
 0x4c6   :  { %1681 = vtanh.f32 %v1018_v25 }
 0x4c7   :  { %1683 = vtanh.f32 %v1033_v32 }
 0x4d0   :  { %v1678_v6 = vpop.eup %1677 }
 0x4d1   :  { %v1026_v58 = vmul.f32 0.5, %v1678_v6 }
 0x4d2   :  { %v1680_v44 = vpop.eup %1679 }
 0x4d3   :  { %v1027_v50 = vadd.f32 0.5, %v1026_v58  ;;  %v1030_v51 = vmul.f32 0.5, %v1680_v44  ;;  %v1682_v52 = vpop.eup %1681 }
 0x4d4   :  { %v1684_v56 = vpop.eup %1683 }
 0x4d5   :  { %v1031_v0 = vadd.f32 0.5, %v1030_v51  ;;  %v1038_v60 = vmul.f32 %v1682_v52, %v1027_v50  ;;  %v1035_v1 = vmul.f32 0.5, %v1684_v56 }
 0x4d7   :  { %v1037_v45 = vmul.f32 %v1031_v0, %v2222_v35  ;;  %v1036_v5 = vadd.f32 0.5, %v1035_v1  ;;  %v2300_v35 = vld [vmem:[#allocation5 + $0xa8] ss:$16 sps:$4 sm:$0xff]   ;;  %v1742_v1 = vld [vmem:[#allocation5 + $0x2c] ss:$16 sps:$4 sm:$0xff]  }
 0x4d9   :  { %v2268_v54 = vadd.f32 %v1038_v60, %v1037_v45 }
 0x4db   :  { %1685 = vtanh.f32 %v2268_v54 }
 0x4e8   :  { %v1686_v8 = vpop.eup %1685 }
 0x4e9   :  { %v1041_v9 = vmul.f32 %v1686_v8, %v1036_v5  ;;  %v1743_v5 = vld [vmem:[#allocation5 + $0x20] ss:$16 sps:$4 sm:$0xff]   ;;  %v1744_v8 = vld [vmem:[#allocation5 + $0x28] ss:$16 sps:$4 sm:$0xff]  }
 0x4eb   :  { %v1042_v7 = vpack.c.bf16 %v1041_v9, %v1041_v9  ;;  %v1745_v9 = vld [vmem:[#allocation5 + $0x4] ss:$16 sps:$4 sm:$0xff]  }
 0x4ed   :  { %1080 = vmatmul.mubr.bf16.vlgmr.msra.gmra.mxu0 %v1042_v7  ;;  %1121 = vmatmul.mubr.bf16.vlgmr.msra.gmra.mxu1 %v1042_v7  ;;  %v1746_v7 = vld [vmem:[#allocation5 + $0xc] ss:$16 sps:$4 sm:$0xff]  }
 0x4ee   :  { %1153 = vmatpush1.bf16.msra.mxu0 %v2271_v48  ;;  %1194 = vmatpush1.bf16.msra.mxu1 %v2274_v49 }
 0x4ef   :  { %1154 = vmatprep.subr.bf16.mxu0 %v2277_v27  ;;  %1195 = vmatprep.subr.bf16.mxu1 %v2280_v55 }
 0x4f0   :  { %1184 = vmatprep.mubr.bf16.mxu0 %v2449_v57  ;;  %1225 = vmatprep.mubr.bf16.mxu1 %v2449_v57 }
 0x4f2   :  { %1155 = vmatpush1.bf16.msra.mxu0 %v2285_v62  ;;  %1196 = vmatpush1.bf16.msra.mxu1 %v2288_v3 }
 0x4f3   :  { %1156 = vmatprep.subr.bf16.mxu0 %v2291_v2  ;;  %1197 = vmatprep.subr.bf16.mxu1 %v2294_v53 }
 0x4f6   :  { %1157 = vmatpush1.bf16.msra.mxu0 %v2297_v59  ;;  %1198 = vmatpush1.bf16.msra.mxu1 %v2300_v35 }
 0x4f7   :  { %1158 = vmatprep.subr.bf16.mxu0 %v2303_v63  ;;  %1199 = vmatprep.subr.bf16.mxu1 %v2306_v16 }
 0x4fa   :  { %1159 = vmatpush1.bf16.msra.mxu0 %v2309_v61  ;;  %1200 = vmatpush1.bf16.msra.mxu1 %v2312_v47 }
 0x4fb   :  { %1160 = vmatprep.subr.bf16.mxu0 %v2315_v46  ;;  %1201 = vmatprep.subr.bf16.mxu1 %v2318_v43 }
 0x4fe   :  { %1161 = vmatpush1.bf16.msra.mxu0 %v2321_v12  ;;  %1202 = vmatpush1.bf16.msra.mxu1 %v2324_v13 }
 0x4ff   :  { %1162 = vmatprep.subr.bf16.mxu0 %v2327_v14  ;;  %1203 = vmatprep.subr.bf16.mxu1 %v2330_v15 }
 0x502   :  { %1163 = vmatpush1.bf16.msra.mxu0 %v2333_v17  ;;  %1204 = vmatpush1.bf16.msra.mxu1 %v1928_v33 }
 0x503   :  { %1164 = vmatprep.subr.bf16.mxu0 %v1930_v34  ;;  %1205 = vmatprep.subr.bf16.mxu1 %v1937_v36 }
 0x506   :  { %1165 = vmatpush1.bf16.msra.mxu0 %v1941_v37  ;;  %1206 = vmatpush1.bf16.msra.mxu1 %v1943_v38  ;;  %v2459_v38 = vld [vmem:[#allocation19_spill] sm:$0xff] }
 0x507   :  { %1166 = vmatprep.subr.bf16.mxu0 %v1945_v39  ;;  %1207 = vmatprep.subr.bf16.mxu1 %v1947_v40  ;;  %v2460_v40 = vld [vmem:[#allocation18_spill] sm:$0xff] }
 0x50a   :  { %1167 = vmatpush1.bf16.msra.mxu0 %v1953_v41  ;;  %1208 = vmatpush1.bf16.msra.mxu1 %v1955_v42 }
 0x50b   :  { %1257 = vmatprep.subr.bf16.mxu0 %v2257_v10  ;;  %1298 = vmatprep.subr.bf16.mxu1 %v2260_v11  ;;  %v2461_v10 = vld [vmem:[#allocation20_spill] sm:$0xff] }
 0x5ad   :  { %v1081_v33 = vpop.f32.mrf.mxu0  ;;  %v1122_v34 = vpop.f32.mrf.mxu1 }
 0x5ae   :  { %v1082_v36 = vadd.f32 %v1081_v33, %v2458_v18  ;;  %v1123_v41 = vadd.f32 %v1122_v34, %v2460_v40 }
 0x5af   :  { %v1083_v19 = vpop.f32.mrf.mxu0  ;;  %v1124_v37 = vpop.f32.mrf.mxu1 }
 0x5b0   :  { %v1129_v20 = vmul.f32 0.5, %v1082_v36  ;;  %v1084_v21 = vadd.f32 %v1083_v19, %v2459_v38  ;;  %v1125_v11 = vadd.f32 %v1124_v37, %v2461_v10  ;;  %v1629_v10 = vld [vmem:[%s2425_s4 + $0x38] sm:$0xff]  }
 0x5b1   :  { %v1085_v39 = vpop.f32.mrf.mxu0  ;;  %v1126_v22 = vpop.f32.mrf.mxu1 }
 0x5b2   :  { %1687 = vtanh.f32 %v1129_v20  ;;  %v1133_v23 = vmul.f32 0.5, %v1084_v21  ;;  %v1138_v25 = vmul.f32 0.5, %v1125_v11  ;;  %v1798_v11 = vmov 0.0  }
 0x5b3   :  { %v1086_v42 = vpop.f32.mrf.mxu0  ;;  %v1127_v24 = vpop.f32.mrf.mxu1 }
 0x5b4   :  { %1689 = vtanh.f32 %v1133_v23 }
 0x5b5   :  { %1691 = vtanh.f32 %v1123_v41 }
 0x5b6   :  { %1693 = vtanh.f32 %v1138_v25  ;;  %v1630_v25 = vld [vmem:[%s2425_s4 + $0x30] sm:$0xff]  }
 0x5bf   :  { %v1688_v26 = vpop.eup %1687 }
 0x5c0   :  { %v1131_v28 = vmul.f32 0.5, %v1688_v26  ;;  %v1631_v26 = vld [vmem:[%s2425_s4 + $0x28] sm:$0xff]  }
 0x5c1   :  { %v1690_v29 = vpop.eup %1689 }
 0x5c2   :  { %v1132_v30 = vadd.f32 0.5, %v1131_v28  ;;  %v1135_v31 = vmul.f32 0.5, %v1690_v29  ;;  %v1692_v32 = vpop.eup %1691  ;;  %v1632_v28 = vld [vmem:[%s2425_s4 + $0x20] sm:$0xff]   ;;  %v1633_v29 = vld [vmem:[%s2425_s4 + $0x18] sm:$0xff]  }
 0x5c3   :  { %v1694_v51 = vpop.eup %1693 }
 0x5c4   :  { %v1136_v6 = vadd.f32 0.5, %v1135_v31  ;;  %v1143_v58 = vmul.f32 %v1692_v32, %v1132_v30  ;;  %v1140_v52 = vmul.f32 0.5, %v1694_v51  ;;  %v1634_v30 = vld [vmem:[%s2425_s4 + $0x10] sm:$0xff]   ;;  %v1635_v31 = vld [vmem:[%s2425_s4 + $0x8] sm:$0xff]   ;;  %v1636_v32 = vld [vmem:[%s2425_s4] sm:$0xff]  }
 0x5c6   :  { %v1142_v44 = vmul.f32 %v1136_v6, %v2268_v54  ;;  %v1141_v0 = vadd.f32 0.5, %v1140_v52  ;;  %v1741_v54 = vld [vmem:[#allocation5 + $0x24] ss:$16 sps:$4 sm:$0xff]  }
 0x5c8   :  { %v2352_v50 = vadd.f32 %v1143_v58, %v1142_v44  ;;  %v2466_v44 = vld [vmem:[#allocation25_spill] sm:$0xff] }
 0x5ca   :  { %1695 = vtanh.f32 %v2352_v50 }
 0x5d7   :  { %v1696_v60 = vpop.eup %1695 }
 0x5d8   :  { %v1146_v45 = vmul.f32 %v1696_v60, %v1141_v0 }
 0x5da   :  { %v1147_v56 = vpack.c.bf16 %v1146_v45, %v1146_v45 }
 0x5dc   :  { %1185 = vmatmul.mubr.bf16.vlgmr.msra.gmra.mxu0 %v1147_v56  ;;  %1226 = vmatmul.mubr.bf16.vlgmr.msra.gmra.mxu1 %v1147_v56 }
 0x5dd   :  { %1258 = vmatpush1.bf16.msra.mxu0 %v2271_v48  ;;  %1299 = vmatpush1.bf16.msra.mxu1 %v2274_v49  ;;  %v1747_v48 = vld [vmem:[#allocation5] ss:$16 sps:$4 sm:$0xff]   ;;  %v1748_v49 = vld [vmem:[#allocation5 + $0x8] ss:$16 sps:$4 sm:$0xff]  }
 0x5de   :  { %1259 = vmatprep.subr.bf16.mxu0 %v2277_v27  ;;  %1300 = vmatprep.subr.bf16.mxu1 %v2280_v55 }
 0x5df   :  { %1289 = vmatprep.mubr.bf16.mxu0 %v2449_v57  ;;  %1330 = vmatprep.mubr.bf16.mxu1 %v2449_v57  ;;  %v1740_v57 = vld [vmem:[#allocation5 + $0x48] ss:$16 sps:$4 sm:$0xff]  }
 0x5e1   :  { %1260 = vmatpush1.bf16.msra.mxu0 %v2285_v62  ;;  %1301 = vmatpush1.bf16.msra.mxu1 %v2288_v3  ;;  %v2462_v62 = vld [vmem:[#allocation21_spill] sm:$0xff] }
 0x5e2   :  { %1261 = vmatprep.subr.bf16.mxu0 %v2291_v2  ;;  %1302 = vmatprep.subr.bf16.mxu1 %v2294_v53 }
 0x5e5   :  { %1262 = vmatpush1.bf16.msra.mxu0 %v2297_v59  ;;  %1303 = vmatpush1.bf16.msra.mxu1 %v2300_v35  ;;  %v2463_v35 = vld [vmem:[#allocation23_spill] sm:$0xff] }
 0x5e6   :  { %1263 = vmatprep.subr.bf16.mxu0 %v2303_v63  ;;  %1304 = vmatprep.subr.bf16.mxu1 %v2306_v16 }
 0x5e9   :  { %1264 = vmatpush1.bf16.msra.mxu0 %v2309_v61  ;;  %1305 = vmatpush1.bf16.msra.mxu1 %v2312_v47  ;;  %v2464_v47 = vld [vmem:[#allocation22_spill] sm:$0xff] }
 0x5ea   :  { %1265 = vmatprep.subr.bf16.mxu0 %v2315_v46  ;;  %1306 = vmatprep.subr.bf16.mxu1 %v2318_v43 }
 0x5ed   :  { %1266 = vmatpush1.bf16.msra.mxu0 %v2321_v12  ;;  %1307 = vmatpush1.bf16.msra.mxu1 %v2324_v13 }
 0x5ee   :  { %1267 = vmatprep.subr.bf16.mxu0 %v2327_v14  ;;  %1308 = vmatprep.subr.bf16.mxu1 %v2330_v15  ;;  %v2465_v14 = vld [vmem:[#allocation24_spill] sm:$0xff] }
 0x5f1   :  { %1268 = vmatpush1.bf16.msra.mxu0 %v2333_v17  ;;  %1309 = vmatpush1.bf16.msra.mxu1 %v1740_v57  ;;  %v2467_v57 = vld [vmem:[#allocation26_spill] sm:$0xff] }
 0x5f2   :  { %1269 = vmatprep.subr.bf16.mxu0 %v1741_v54  ;;  %1310 = vmatprep.subr.bf16.mxu1 %v1742_v1 }
 0x5f5   :  { %1270 = vmatpush1.bf16.msra.mxu0 %v1743_v5  ;;  %1311 = vmatpush1.bf16.msra.mxu1 %v1744_v8 }
 0x5f6   :  { %1271 = vmatprep.subr.bf16.mxu0 %v1745_v9  ;;  %1312 = vmatprep.subr.bf16.mxu1 %v1746_v7  ;;  %v2468_v9 = vld [vmem:[#allocation27_spill] sm:$0xff] }
 0x5f9   :  { %1272 = vmatpush1.bf16.msra.mxu0 %v1747_v48  ;;  %1313 = vmatpush1.bf16.msra.mxu1 %v1748_v49 }
 0x5fa   :  { %1544 = vmatprep.subr.bf16.mxu0 %v1798_v11 }
 0x69c   :  { %v1186_v27 = vpop.f32.mrf.mxu0  ;;  %v1227_v55 = vpop.f32.mrf.mxu1 }
 0x69d   :  { %v1187_v3 = vadd.f32 %v1186_v27, %v2462_v62  ;;  %v1228_v46 = vadd.f32 %v1227_v55, %v2464_v47 }
 0x69e   :  { %v1188_v2 = vpop.f32.mrf.mxu0  ;;  %v1229_v53 = vpop.f32.mrf.mxu1 }
 0x69f   :  { %v1234_v59 = vmul.f32 0.5, %v1187_v3  ;;  %v1189_v63 = vadd.f32 %v1188_v2, %v2463_v35  ;;  %v1230_v15 = vadd.f32 %v1229_v53, %v2465_v14 }
 0x6a0   :  { %v1190_v16 = vpop.f32.mrf.mxu0  ;;  %v1231_v61 = vpop.f32.mrf.mxu1 }
 0x6a1   :  { %1697 = vtanh.f32 %v1234_v59  ;;  %v1238_v43 = vmul.f32 0.5, %v1189_v63  ;;  %v1243_v17 = vmul.f32 0.5, %v1230_v15 }
 0x6a2   :  { %v1191_v12 = vpop.f32.mrf.mxu0  ;;  %v1232_v13 = vpop.f32.mrf.mxu1 }
 0x6a3   :  { %1699 = vtanh.f32 %v1238_v43  ;;  %v1526_v12 = vld [vmem:[%s2426_s5] ss:$0 sm:$0xff] }
 0x6a4   :  { %1701 = vtanh.f32 %v1228_v46 }
 0x6a5   :  { %1703 = vtanh.f32 %v1243_v17 }
 0x6ae   :  { %v1698_v33 = vpop.eup %1697 }
 0x6af   :  { %v1236_v34 = vmul.f32 0.5, %v1698_v33 }
 0x6b0   :  { %v1700_v18 = vpop.eup %1699 }
 0x6b1   :  { %v1237_v36 = vadd.f32 0.5, %v1236_v34  ;;  %v1240_v19 = vmul.f32 0.5, %v1700_v18  ;;  %v1702_v37 = vpop.eup %1701 }
 0x6b2   :  { %v1704_v22 = vpop.eup %1703 }
 0x6b3   :  { %v1241_v20 = vadd.f32 0.5, %v1240_v19  ;;  %v1248_v38 = vmul.f32 %v1702_v37, %v1237_v36  ;;  %v1245_v40 = vmul.f32 0.5, %v1704_v22 }
 0x6b5   :  { %v1247_v21 = vmul.f32 %v1241_v20, %v2352_v50  ;;  %v1246_v41 = vadd.f32 0.5, %v1245_v40 }
 0x6b7   :  { %v2383_v39 = vadd.f32 %v1248_v38, %v1247_v21 }
 0x6b9   :  { %1705 = vtanh.f32 %v2383_v39 }
 0x6c6   :  { %v1706_v23 = vpop.eup %1705 }
 0x6c7   :  { %v1251_v42 = vmul.f32 %v1706_v23, %v1246_v41 }
 0x6c9   :  { %v1252_v24 = vpack.c.bf16 %v1251_v42, %v1251_v42 }
 0x6cb   :  { %1290 = vmatmul.mubr.bf16.vlgmr.msra.gmra.mxu0 %v1252_v24  ;;  %1331 = vmatmul.mubr.bf16.vlgmr.msra.gmra.mxu1 %v1252_v24 }
 0x6cc   :  { %1545 = vmatpush3.bf16.msra.mxu0 %v1629_v10  ;;  %1560 = vmatprep.mubr.msk.bf16.mxu0 %vm1799_vm2, %v1798_v11 }
 0x6cd   :  { %1546 = vmatprep.subr.bf16.mxu0 %v1798_v11 }
 0x6d0   :  { %1547 = vmatpush3.bf16.msra.mxu0 %v1630_v25 }
 0x6d1   :  { %1548 = vmatprep.subr.bf16.mxu0 %v1798_v11 }
 0x6d4   :  { %1549 = vmatpush3.bf16.msra.mxu0 %v1631_v26 }
 0x6d5   :  { %1550 = vmatprep.subr.bf16.mxu0 %v1798_v11 }
 0x6d8   :  { %1551 = vmatpush3.bf16.msra.mxu0 %v1632_v28 }
 0x6d9   :  { %1552 = vmatprep.subr.bf16.mxu0 %v1798_v11 }
 0x6dc   :  { %1553 = vmatpush3.bf16.msra.mxu0 %v1633_v29 }
 0x6dd   :  { %1554 = vmatprep.subr.bf16.mxu0 %v1798_v11 }
 0x6e0   :  { %1555 = vmatpush3.bf16.msra.mxu0 %v1634_v30 }
 0x6e1   :  { %1556 = vmatprep.subr.bf16.mxu0 %v1798_v11 }
 0x6e4   :  { %1557 = vmatpush3.bf16.msra.mxu0 %v1635_v31 }
 0x6e5   :  { %1558 = vmatprep.subr.bf16.mxu0 %v1798_v11 }
 0x6e8   :  { %1559 = vmatpush3.bf16.msra.mxu0 %v1636_v32 }
 0x78b   :  { %v1291_v6 = vpop.f32.mrf.mxu0  ;;  %v1332_v58 = vpop.f32.mrf.mxu1 }
 0x78c   :  { %v1292_v50 = vadd.f32 %v1291_v6, %v2466_v44  ;;  %v1333_v54 = vadd.f32 %v1332_v58, %v2467_v57 }
 0x78d   :  { %v1293_v51 = vpop.f32.mrf.mxu0  ;;  %v1334_v52 = vpop.f32.mrf.mxu1 }
 0x78e   :  { %v1339_v0 = vmul.f32 0.5, %v1292_v50  ;;  %v1294_v60 = vadd.f32 %v1293_v51, %v2086_v4  ;;  %v1335_v7 = vadd.f32 %v1334_v52, %v2468_v9 }
 0x78f   :  { %v1295_v45 = vpop.f32.mrf.mxu0  ;;  %v1336_v56 = vpop.f32.mrf.mxu1 }
 0x790   :  { %1707 = vtanh.f32 %v1339_v0  ;;  %v1343_v1 = vmul.f32 0.5, %v1294_v60  ;;  %v1348_v48 = vmul.f32 0.5, %v1335_v7 }
 0x791   :  { %v1296_v5 = vpop.f32.mrf.mxu0  ;;  %v1337_v8 = vpop.f32.mrf.mxu1 }
 0x792   :  { %1709 = vtanh.f32 %v1343_v1 }
 0x793   :  { %1711 = vtanh.f32 %v1333_v54 }
 0x794   :  { %1713 = vtanh.f32 %v1348_v48 }
 0x79d   :  { %v1708_v49 = vpop.eup %1707 }
 0x79e   :  { %v1341_v27 = vmul.f32 0.5, %v1708_v49 }
 0x79f   :  { %v1710_v55 = vpop.eup %1709 }
 0x7a0   :  { %v1342_v62 = vadd.f32 0.5, %v1341_v27  ;;  %v1345_v3 = vmul.f32 0.5, %v1710_v55  ;;  %v1712_v4 = vpop.eup %1711 }
 0x7a1   :  { %v1714_v63 = vpop.eup %1713 }
 0x7a2   :  { %v1346_v2 = vadd.f32 0.5, %v1345_v3  ;;  %v1353_v53 = vmul.f32 %v1712_v4, %v1342_v62  ;;  %v1350_v16 = vmul.f32 0.5, %v1714_v63 }
 0x7a4   :  { %v1352_v59 = vmul.f32 %v1346_v2, %v2383_v39  ;;  %v1351_v61 = vadd.f32 0.5, %v1350_v16 }
 0x7a6   :  { %v1354_v35 = vadd.f32 %v1353_v53, %v1352_v59 }
 0x7a8   :  { %1715 = vtanh.f32 %v1354_v35 }
 0x7b5   :  { %v1716_v47 = vpop.eup %1715 }
 0x7b6   :  { %v1356_v46 = vmul.f32 %v1716_v47, %v1351_v61 }
 0x7b8   :  { %v1357_v43 = vpack.c.bf16 %v1356_v46, %v1356_v46 }
 0x7ba   :  { %1561 = vmatmul.mubr.bf16.vlgmr.msra.gmra.mxu0 %v1357_v43 }
 0x87a   :  { %v1463_v13 = vpop.f32.mrf.mxu0 }
 0x87b   :  { %v1464_v14 = vadd.f32 %v1526_v12, %v1463_v13 }
 0x87c   :  { %v1562_v15 = vpop.f32.mrf.mxu0 }
 0x87d   :  { %1469 = vst [vmem:[%s2427_s6] sm:$0xff] %v1464_v14 }
 0x87e   :  { %v1466_v17 = vpop.f32.mrf.mxu0 }
 0x880   :  { %v1563_v33 = vpop.f32.mrf.mxu0 }
 0x881   :  { %1474 = vsyncpa [#allocation4], 1 }
 0x882   :  { %1475 = vsyncpa [#allocation6], 1 }

</bundles_post_ra>
